<compile_context>
chip_gen: v7x
topology: tpu7x:2x2x1
jax: 0.10.0
libtpu: 0.0.40
codegen_flags: <defaults>
</compile_context>

<pallas_src>
import jax
import jax.numpy as jnp
from jax import lax
from jax.experimental import pallas as pl
from jax.experimental.pallas import tpu as pltpu


# ---------------------------------------------------------------------------
# Kernels
# ---------------------------------------------------------------------------
def _qkt_batched_kernel(a_ref, b_ref, o_ref):
    # a_ref: (G, S, D), b_ref: (G, S, D), o_ref: (G, S, S)
    a = a_ref[...].astype(jnp.bfloat16)
    b = b_ref[...].astype(jnp.bfloat16)
    o_ref[...] = jnp.einsum(
        "gsd,gtd->gst", a, b, preferred_element_type=jnp.float32
    ).astype(o_ref.dtype)


def _qkt_tiled_kernel(a_ref, b_ref, o_ref):
    # a_ref: (TM, D), b_ref: (TN, D), o_ref: (TM, TN)
    a = a_ref[...].astype(jnp.bfloat16)
    b = b_ref[...].astype(jnp.bfloat16)
    o_ref[...] = lax.dot_general(
        a, b,
        dimension_numbers=(((1,), (1,)), ((), ())),  # contract last dims: A @ B.T
        preferred_element_type=jnp.float32,
    ).astype(o_ref.dtype)


# ---------------------------------------------------------------------------
# Wrapper
# ---------------------------------------------------------------------------
def _pick_group(bh, s, d, in_itemsize, out_itemsize, budget_bytes=8 * 1024 * 1024):
    """Largest divisor G of BH (<= 8) whose double-buffered working set fits
    the budget; prefer a G whose grid extent is even and >= 2 (v7x megacore)."""
    per_head = 2 * (s * s * out_itemsize + 2 * s * d * in_itemsize)  # double-buffered
    best, best_even = 1, None
    for g in range(1, min(bh, 8) + 1):
        if bh % g:
            continue
        if g * per_head > budget_bytes:
            continue
        best = g
        steps = bh // g
        if steps >= 2 and steps % 2 == 0:
            best_even = g
    return best_even if best_even is not None else best


def transpose_matmul(x111, x116, *, tm=512, tn=512):
    """out = x111 @ x116.transpose(-1, -2); both inputs shaped [B, H, S, D]."""
    B, H, S, D = x111.shape
    assert x116.shape == (B, H, S, D)
    BH = B * H
    a = x111.reshape(BH, S, D)
    b = x116.reshape(BH, S, D)
    out_dtype = x111.dtype
    in_itemsize = jnp.dtype(x111.dtype).itemsize
    out_itemsize = jnp.dtype(out_dtype).itemsize
    flops = 2 * BH * S * S * D

    # ---- Small-S path: full (S, S) logits per head is tiny; batch G heads per
    # grid step so each step moves enough bytes to hide DMA behind compute.
    if S * S * out_itemsize <= (1 << 20):
        G = _pick_group(BH, S, D, in_itemsize, out_itemsize)
        grid = (BH // G,)
        cost = pl.CostEstimate(
            flops=flops,
            transcendentals=0,
            bytes_accessed=in_itemsize * 2 * BH * S * D + out_itemsize * BH * S * S,
        )
        out = pl.pallas_call(
            _qkt_batched_kernel,
            out_shape=jax.ShapeDtypeStruct((BH, S, S), out_dtype),
            grid_spec=pltpu.PrefetchScalarGridSpec(
                num_scalar_prefetch=0,
                grid=grid,
                in_specs=[
                    pl.BlockSpec((G, S, D), lambda g: (g, 0, 0)),
                    pl.BlockSpec((G, S, D), lambda g: (g, 0, 0)),
                ],
                out_specs=pl.BlockSpec((G, S, S), lambda g: (g, 0, 0)),
            ),
            compiler_params=pltpu.CompilerParams(
                dimension_semantics=("parallel",),
            ),
            cost_estimate=cost,
        )(a, b)
        return out.reshape(B, H, S, S)

    # ---- Large-S path: tile the (S, S) output with fixed lane-dense tiles.
    # Never falls back to a full S x S block (VMEM safety on v7x); ragged last
    # blocks are masked by Pallas. D stays full-extent so masking is exact.
    tm = min(tm, S)
    tn = min(tn, S)
    gi = pl.cdiv(S, tm)
    gj = pl.cdiv(S, tn)
    grid = (BH, gi, gj)
    cost = pl.CostEstimate(
        flops=flops,
        transcendentals=0,
        # A read once per (g, i); B re-read gi times (j is the inner sweep).
        bytes_accessed=in_itemsize * (BH * S * D + gi * BH * S * D)
        + out_itemsize * BH * S * S,
    )
    out = pl.pallas_call(
        _qkt_tiled_kernel,
        out_shape=jax.ShapeDtypeStruct((BH, S, S), out_dtype),
        grid_spec=pltpu.PrefetchScalarGridSpec(
            num_scalar_prefetch=0,
            grid=grid,
            in_specs=[
                # A tile is invariant over j -> Pallas skips re-DMA across the N sweep.
                pl.BlockSpec((None, tm, D), lambda g, i, j: (g, i, 0)),
                pl.BlockSpec((None, tn, D), lambda g, i, j: (g, j, 0)),
            ],
            out_specs=pl.BlockSpec((None, tm, tn), lambda g, i, j: (g, i, j)),
        ),
        compiler_params=pltpu.CompilerParams(
            dimension_semantics=("parallel", "parallel", "parallel"),
        ),
        cost_estimate=cost,
    )(a, b)
    return out.reshape(B, H, S, S)


if __name__ == "__main__":
    # Shapes from the original module: x111, x116 = [1, 12, 384, 64].
    B, H, S, D = 1, 12, 384, 64
    key = jax.random.PRNGKey(0)
    k1, k2 = jax.random.split(key)
    x111 = jax.random.normal(k1, (B, H, S, D), dtype=jnp.float32)
    x116 = jax.random.normal(k2, (B, H, S, D), dtype=jnp.float32)

    out = transpose_matmul(x111, x116)
    jax.block_until_ready(out)

    # Reference (== torch.matmul(x111, x116.transpose(-1, -2))). The kernel feeds
    # bf16 operands to the MXU with f32 accumulation, so tolerances are loosened
    # per review guidance (~1e-2 relative for a D=64 contraction).
    ref = jnp.einsum("bhsd,bhtd->bhst", x111, x116)
    assert out.shape == (B, H, S, S)
    assert out.dtype == ref.dtype
    assert jnp.allclose(out, ref, atol=0.5, rtol=2e-2)
    print("KERNEL_OK")
</pallas_src>

<mosaic_0001>
module attributes {stable_mosaic.version = 11 : i64} {
  func.func @_qkt_batched_kernel(%arg0: i32, %arg1: memref<3x384x64xf32, #tpu.memory_space<vmem>>, %arg2: memref<3x384x64xf32, #tpu.memory_space<vmem>>, %arg3: memref<3x384x384xf32, #tpu.memory_space<vmem>>) attributes {dimension_semantics = [#tpu.dimension_semantics<parallel>], iteration_bounds = array<i64: 4>, scalar_prefetch = 0 : i64, scratch_operands = 0 : i64, tpu.core_type = #tpu.core_type<tc>, window_params = [{transform_indices = @transform_0, window_bounds = array<i64: 3, 384, 64>}, {transform_indices = @transform_1, window_bounds = array<i64: 3, 384, 64>}, {transform_indices = @transform_2, window_bounds = array<i64: 3, 384, 384>}]} {
    %c0 = arith.constant 0 : index
    %c0_0 = arith.constant 0 : index
    %c0_1 = arith.constant 0 : index
    %0 = vector.load %arg1[%c0, %c0_0, %c0_1] : memref<3x384x64xf32, #tpu.memory_space<vmem>>, vector<3x384x64xf32>
    %1 = arith.truncf %0 : vector<3x384x64xf32> to vector<3x384x64xbf16>
    %c0_2 = arith.constant 0 : index
    %c0_3 = arith.constant 0 : index
    %c0_4 = arith.constant 0 : index
    %2 = vector.load %arg2[%c0_2, %c0_3, %c0_4] : memref<3x384x64xf32, #tpu.memory_space<vmem>>, vector<3x384x64xf32>
    %3 = arith.truncf %2 : vector<3x384x64xf32> to vector<3x384x64xbf16>
    "tpu.trace_start"() <{level = 10 : i32, message = "gsd,gtd->gst"}> : () -> ()
    %cst = arith.constant dense<0.000000e+00> : vector<3x384x384xf32>
    %4 = tpu.matmul %1, %3, %cst {dimension_numbers = #tpu.dot_dimension_numbers<[2], [2], [1], [1], [0, 0, 0, 1, 1, 1], [0], [0]>} : vector<3x384x64xbf16>, vector<3x384x64xbf16>, vector<3x384x384xf32> -> vector<3x384x384xf32>
    "tpu.trace_stop"() : () -> ()
    %c0_5 = arith.constant 0 : index
    %c0_6 = arith.constant 0 : index
    %c0_7 = arith.constant 0 : index
    %5 = vector.load %arg3[%c0_5, %c0_6, %c0_7] : memref<3x384x384xf32, #tpu.memory_space<vmem>>, vector<3x384x384xf32>
    tpu.vector_store %arg3[%c0_5, %c0_6, %c0_7], %4 {strides = array<i32>} : memref<3x384x384xf32, #tpu.memory_space<vmem>>, vector<3x384x384xf32>,
    return
  }
  func.func @transform_0(%arg0: i32) -> (i32, i32, i32) {
    %c0_i32 = arith.constant 0 : i32
    %c0_i32_0 = arith.constant 0 : i32
    %c0_i32_1 = arith.constant 0 : i32
    return %arg0, %c0_i32, %c0_i32_0 : i32, i32, i32
  }
  func.func @transform_1(%arg0: i32) -> (i32, i32, i32) {
    %c0_i32 = arith.constant 0 : i32
    %c0_i32_0 = arith.constant 0 : i32
    %c0_i32_1 = arith.constant 0 : i32
    return %arg0, %c0_i32, %c0_i32_0 : i32, i32, i32
  }
  func.func @transform_2(%arg0: i32) -> (i32, i32, i32) {
    %c0_i32 = arith.constant 0 : i32
    %c0_i32_0 = arith.constant 0 : i32
    %c0_i32_1 = arith.constant 0 : i32
    return %arg0, %c0_i32, %c0_i32_0 : i32, i32, i32
  }
}

</mosaic_0001>

<bundles_post_ra>
// kernel: tpu_custom_call.1
= control target key start
LH: loop header
LB: loop body
LE: loop exit
PB: predicated region body
PF: predicated region fallthrough
CT: control target
= control target key end

     0   :  { %7 = vsyncpa [#allocation3], 0  ;;  %s5450_s0 = inlined_call_operand.vmem [shape: f32[12,384,64], index: 0, kind: input, shape index: {}]   ;;  %s5451_s1 = inlined_call_operand.vmem [shape: f32[12,384,64], index: 1, kind: input, shape index: {}]   ;;  %s5452_s2 = inlined_call_operand.hbm [shape: f32[12,384,384], index: 2, kind: output, shape index: {}]  }
   0x1   :  { %9 = vsyncpa [#allocation3 + $0x1], 0  ;;  %s3886_s9 = smov 0   ;;  %s3888_s10 = smov 0  }
   0x2   :  { %s3890_s11 = smov 0   ;;  %s3892_s12 = smov 0  }
   0x3 LB: > { %s3907_s13 = sadd.s32 4294967295, %s3866_s12   ;;  %s3054_s14 = sadd.s32 4294967294, %s3866_s12   ;;  %s3866_s12 = sphi %s3892_s12, %s5458_s12   ;;  %s3862_s11 = sphi %s3890_s11, %s5457_s11   ;;  %s3858_s10 = sphi %s3888_s10, %s5456_s10   ;;  %s3854_s9 = sphi %s3886_s9, %s5455_s9  }
   0x4   : > { %s3911_s15 = sadd.s32 1, %s3866_s12   ;;  %s74_s16 = sadd.s32 1, %s3862_s11 }
   0x5   : > { %s71_s17 = ssub.s32 %s3866_s12, %s3911_s15  ;;  %p84_p0 = scmp.ne.s32.totalorder %s3862_s11, %s3858_s10 }
   0x6   : > { %p72_p1 = scmp.eq.s32.totalorder %s71_s17, 0  ;;  %p85_p2 = scmp.eq.s32.totalorder %s3907_s13, 3 }
   0x7   : > { %p90_p3 = scmp.ne.s32.totalorder %s3858_s10, %s3854_s9  ;;  %p91_p4 = scmp.eq.s32.totalorder %s3054_s14, 3 }
   0x8   : > { %s3922_s18 = scalar_select %p72_p1, %s3862_s11, %s74_s16  }
   0x9   : > { %p3924_p5 = por %p85_p2, %p84_p0  ;;  %p3928_p6 = por %p91_p4, %p90_p3 }
   0xa   : > { %p3057_p7 = scmp.ge.s32.totalorder %s3866_s12, 1  ;;  %p129_p8 = scmp.lt.s32.totalorder %s3866_s12, 5 }
   0xc   : > { %p130_p9 = pnand %p3057_p7, %p129_p8 }
   0xd   : > { %s158_s21 = smul.u32 (!%p130_p9), 3, %s3907_s13  ;;  %vm606_vm0 = vcmask (!%p130_p9), 523264   ;;  %s155_s29 = sand.u32 (!%p130_p9), 1, %s3858_s10  }
   0xe   : > { %133 = sbr.rel (%p130_p9) target bundleno = 764 (0x2fc), region = 28  ;;  %s3868_s16 = smov (!%p130_p9), [#allocation2]  }
   0xf   : > { %p159_p10 = scmp.lt.s32.totalorder (!%p130_p9), %s158_s21, 11  ;;  %s3759_s30 = smul.u32 (!%p130_p9), 3456, %s155_s29 }
  0x10   : > { %s3768_s4 = smul.u32 (!%p130_p9), 55296, %s3907_s13  ;;  %s5409_s13 = scalar_lea.sflag (!%p130_p9), [#allocation3], %s155_s29 }
  0x11   : > { %s4593_s3 = scalar_lea.vmem (!%p130_p9), [#allocation2], %s3759_s30  ;;  %s3808_s17 = sshll.u32 (!%p130_p9), %s3868_s16, 4  ;;  %s3809_s17 = int_to_ptr.vmem [resolvable:$false] %s3808_s17 }
  0x12   : > { %s2980_s5 = sshll.u32 (!%p130_p9), %s4593_s3, 4  ;;  %s5397_s8 = scalar_lea.hbm (!%p130_p9), %s5452_s2, %s3768_s4  ;;  %s5399_s5 = int_to_ptr.vmem [resolvable:$true] %s2980_s5 }
  0x13   : > { %s3804_s14 = scalar_lea.vmem (!%p130_p9), %s5399_s5, 55296  ;;  %p3811_p0 = scmp.lt.s32.totalorder (!%p130_p9), %s5399_s5, %s3809_s17 }
  0x14   : > { %p3805_p11 = scmp.ne.s32.totalorder (!%p130_p9), %s5399_s5, %s3804_s14 }
  0x15   : > { %s5460_s21 = smov (!%p159_p10, %s158_s21), 11 }
  0x16   : > { %s3760_s22 = smul.u32 384, %s5460_s21  ;;  %p3806_p12 = pnand %p3805_p11, %p3924_p5 }
  0x17   : > { %s3810_s21 = scalar_lea.vmem %s3809_s17, 110592 }
  0x18   : > { %s3943_s25 = scalar_lea.vmem %s5451_s1, %s3760_s22  ;;  %s3976_s28 = scalar_lea.vmem %s5450_s0, %s3760_s22 }
  0x19   : > { %v406_v0 = vld [vmem:[%s3943_s25 + $0x80] sm:$0xff]  ;;  %v407_v1 = vld [vmem:[%s3943_s25 + $0x88] sm:$0xff]  ;;  %v408_v9 = vld [vmem:[%s3943_s25 + $0x90] sm:$0xff]  ;;  %p3807_p13 = pneg %p3806_p12  ;;  %p3812_p1 = scmp.lt.s32.totalorder %s3810_s21, %s3804_s14 }
  0x1a   : > { %v422_v2 = vld [vmem:[%s3943_s25 + $0x100] sm:$0xff]  ;;  %v542_v3 = vpack.c.bf16 %v407_v1, %v406_v0  ;;  %v423_v4 = vld [vmem:[%s3943_s25 + $0x108] sm:$0xff]  ;;  %v409_v10 = vld [vmem:[%s3943_s25 + $0x98] sm:$0xff] }
  0x1b   : > { %v390_v5 = vld [vmem:[%s3943_s25] sm:$0xff]  ;;  %v391_v6 = vld [vmem:[%s3943_s25 + $0x8] sm:$0xff]  ;;  %v550_v7 = vpack.c.bf16 %v423_v4, %v422_v2  ;;  %v424_v11 = vld [vmem:[%s3943_s25 + $0x110] sm:$0xff]  ;;  %v543_v12 = vpack.c.bf16 %v409_v10, %v408_v9  ;;  %p3813_p2 = por %p3812_p1, %p3811_p0 }
  0x1c   : > { %v534_v8 = vpack.c.bf16 %v391_v6, %v390_v5  ;;  %3703 = vmatprep.subr.msk.bf16.mxu0 %vm606_vm0, %v542_v3  ;;  %v425_v13 = vld [vmem:[%s3943_s25 + $0x118] sm:$0xff]  ;;  %v392_v14 = vld [vmem:[%s3943_s25 + $0x10] sm:$0xff]  ;;  %v410_v20 = vld [vmem:[%s3943_s25 + $0xa0] sm:$0xff] }
  0x1d   : > { %v393_v15 = vld [vmem:[%s3943_s25 + $0x18] sm:$0xff]  ;;  %3711 = vmatprep.subr.msk.bf16.mxu1 %vm606_vm0, %v550_v7  ;;  %v728_v17 = vsel %vm606_vm0, %v550_v7, 0  ;;  %v551_v18 = vpack.c.bf16 %v425_v13, %v424_v11  ;;  %v411_v21 = vld [vmem:[%s3943_s25 + $0xa8] sm:$0xff]  ;;  %v426_v22 = vld [vmem:[%s3943_s25 + $0x120] sm:$0xff]  ;;  %p3814_p3 = pnand %p3813_p2, %p3807_p13 }
  0x1e   : > { %v680_v16 = vsel %vm606_vm0, %v534_v8, 0  ;;  %3496 = vmatpush3.bf16.xpose.msra.mxu1 %v728_v17  ;;  %v535_v19 = vpack.c.bf16 %v393_v15, %v392_v14  ;;  %v427_v23 = vld [vmem:[%s3943_s25 + $0x128] sm:$0xff]  ;;  %v544_v26 = vpack.c.bf16 %v411_v21, %v410_v20  ;;  %v394_v28 = vld [vmem:[%s3943_s25 + $0x20] sm:$0xff]  ;;  %v412_v31 = vld [vmem:[%s3943_s25 + $0xb0] sm:$0xff] }
  0x1f   : > { %3208 = vmatpush3.bf16.xpose.msra.mxu0 %v680_v16  ;;  %3712 = vmatprep.subr.msk.bf16.mxu1 %vm606_vm0, %v551_v18  ;;  %v731_v25 = vsel %vm606_vm0, %v551_v18, 0  ;;  %v552_v27 = vpack.c.bf16 %v427_v23, %v426_v22  ;;  %v395_v29 = vld [vmem:[%s3943_s25 + $0x28] sm:$0xff]  ;;  %v413_v32 = vld [vmem:[%s3943_s25 + $0xb8] sm:$0xff]  ;;  %v428_v33 = vld [vmem:[%s3943_s25 + $0x130] sm:$0xff] }
  0x20   : > { %3704 = vmatprep.subr.msk.bf16.mxu0 %vm606_vm0, %v543_v12  ;;  %v683_v24 = vsel %vm606_vm0, %v535_v19, 0  ;;  %v536_v30 = vpack.c.bf16 %v395_v29, %v394_v28  ;;  %v429_v34 = vld [vmem:[%s3943_s25 + $0x138] sm:$0xff]  ;;  %v174_v35 = vld [vmem:[%s3976_s28] sm:$0xff]  ;;  %v175_v36 = vld [vmem:[%s3976_s28 + $0x8] sm:$0xff]  ;;  %v545_v40 = vpack.c.bf16 %v413_v32, %v412_v31 }
  0x21   : > { %v3986_v37 = vpack.c.bf16 %v175_v36, %v174_v35  ;;  %v734_v39 = vsel %vm606_vm0, %v552_v27, 0  ;;  %v553_v41 = vpack.c.bf16 %v429_v34, %v428_v33  ;;  %v396_v42 = vld [vmem:[%s3943_s25 + $0x30] sm:$0xff]  ;;  %v397_v43 = vld [vmem:[%s3943_s25 + $0x38] sm:$0xff]  ;;  %v414_v45 = vld [vmem:[%s3943_s25 + $0xc0] sm:$0xff] }
  0x22   : > { %v686_v38 = vsel %vm606_vm0, %v536_v30, 0  ;;  %v537_v44 = vpack.c.bf16 %v397_v43, %v396_v42  ;;  %v415_v46 = vld [vmem:[%s3943_s25 + $0xc8] sm:$0xff]  ;;  %v430_v47 = vld [vmem:[%s3943_s25 + $0x140] sm:$0xff]  ;;  %v416_v56 = vld [vmem:[%s3943_s25 + $0xd0] sm:$0xff] }
  0x23   : > { %3223 = vmatprep.mubr.msk.bf16.mxu0 %vm606_vm0, %v3986_v37  ;;  %3511 = vmatprep.mubr.msk.bf16.mxu1 %vm606_vm0, %v3986_v37  ;;  %v431_v48 = vld [vmem:[%s3943_s25 + $0x148] sm:$0xff]  ;;  %v737_v50 = vsel %vm606_vm0, %v553_v41, 0  ;;  %v546_v51 = vpack.c.bf16 %v415_v46, %v414_v45  ;;  %v398_v53 = vld [vmem:[%s3943_s25 + $0x40] sm:$0xff]  ;;  %v417_v57 = vld [vmem:[%s3943_s25 + $0xd8] sm:$0xff] }
  0x24   : > { %v689_v49 = vsel %vm606_vm0, %v537_v44, 0  ;;  %v554_v52 = vpack.c.bf16 %v431_v48, %v430_v47  ;;  %v399_v54 = vld [vmem:[%s3943_s25 + $0x48] sm:$0xff]  ;;  %v432_v58 = vld [vmem:[%s3943_s25 + $0x150] sm:$0xff]  ;;  %v433_v59 = vld [vmem:[%s3943_s25 + $0x158] sm:$0xff]  ;;  %v547_v62 = vpack.c.bf16 %v417_v57, %v416_v56 }
  0x25   : > { %v538_v55 = vpack.c.bf16 %v399_v54, %v398_v53  ;;  %v555_v63 = vpack.c.bf16 %v433_v59, %v432_v58  ;;  %v400_v0 = vld [vmem:[%s3943_s25 + $0x50] sm:$0xff]  ;;  %v401_v1 = vld [vmem:[%s3943_s25 + $0x58] sm:$0xff]  ;;  %v418_v3 = vld [vmem:[%s3943_s25 + $0xe0] sm:$0xff] }
  0x26   : > { %3498 = vmatpush3.bf16.xpose.msra.mxu1 %v731_v25  ;;  %v740_v61 = vsel %vm606_vm0, %v554_v52, 0  ;;  %v539_v2 = vpack.c.bf16 %v401_v1, %v400_v0  ;;  %v419_v4 = vld [vmem:[%s3943_s25 + $0xe8] sm:$0xff]  ;;  %v434_v5 = vld [vmem:[%s3943_s25 + $0x160] sm:$0xff]  ;;  %v420_v14 = vld [vmem:[%s3943_s25 + $0xf0] sm:$0xff] }
  0x27   : > { %3210 = vmatpush3.bf16.xpose.msra.mxu0 %v683_v24  ;;  %3713 = vmatprep.subr.msk.bf16.mxu1 %vm606_vm0, %v552_v27  ;;  %v692_v60 = vsel %vm606_vm0, %v538_v55, 0  ;;  %v435_v6 = vld [vmem:[%s3943_s25 + $0x168] sm:$0xff]  ;;  %v743_v8 = vsel %vm606_vm0, %v555_v63, 0  ;;  %v548_v9 = vpack.c.bf16 %v419_v4, %v418_v3  ;;  %v402_v11 = vld [vmem:[%s3943_s25 + $0x60] sm:$0xff]  ;;  %v421_v15 = vld [vmem:[%s3943_s25 + $0xf8] sm:$0xff] }
  0x28   : > { %3705 = vmatprep.subr.msk.bf16.mxu0 %vm606_vm0, %v544_v26  ;;  %v695_v7 = vsel %vm606_vm0, %v539_v2, 0  ;;  %v556_v10 = vpack.c.bf16 %v435_v6, %v434_v5  ;;  %v403_v12 = vld [vmem:[%s3943_s25 + $0x68] sm:$0xff]  ;;  %v436_v16 = vld [vmem:[%s3943_s25 + $0x170] sm:$0xff]  ;;  %v437_v17 = vld [vmem:[%s3943_s25 + $0x178] sm:$0xff]  ;;  %v549_v20 = vpack.c.bf16 %v421_v15, %v420_v14 }
  0x29   : > { %v540_v13 = vpack.c.bf16 %v403_v12, %v402_v11  ;;  %v557_v21 = vpack.c.bf16 %v437_v17, %v436_v16  ;;  %v404_v22 = vld [vmem:[%s3943_s25 + $0x70] sm:$0xff]  ;;  %v405_v23 = vld [vmem:[%s3943_s25 + $0x78] sm:$0xff]  ;;  %v470_v25 = vld [vmem:[%s3943_s25 + $0x280] sm:$0xff] }
  0x2a   : > { %v746_v19 = vsel %vm606_vm0, %v556_v10, 0  ;;  %v541_v24 = vpack.c.bf16 %v405_v23, %v404_v22  ;;  %v471_v26 = vld [vmem:[%s3943_s25 + $0x288] sm:$0xff]  ;;  %v454_v27 = vld [vmem:[%s3943_s25 + $0x200] sm:$0xff]  ;;  %v176_v35 = vld [vmem:[%s3976_s28 + $0x10] sm:$0xff] }
  0x2b   : > { %v698_v18 = vsel %vm606_vm0, %v540_v13, 0  ;;  %v455_v28 = vld [vmem:[%s3943_s25 + $0x208] sm:$0xff]  ;;  %v749_v30 = vsel %vm606_vm0, %v557_v21, 0  ;;  %v4044_v31 = vpack.c.bf16 %v471_v26, %v470_v25  ;;  %v438_v33 = vld [vmem:[%s3943_s25 + $0x180] sm:$0xff]  ;;  %v177_v36 = vld [vmem:[%s3976_s28 + $0x18] sm:$0xff] }
  0x2c   : > { %v701_v29 = vsel %vm606_vm0, %v541_v24, 0  ;;  %v566_v32 = vpack.c.bf16 %v455_v28, %v454_v27  ;;  %v439_v34 = vld [vmem:[%s3943_s25 + $0x188] sm:$0xff]  ;;  %v319_v42 = vpack.c.bf16 %v177_v36, %v176_v35  ;;  %v457_v43 = vld [vmem:[%s3943_s25 + $0x218] sm:$0xff]  ;;  %v472_v44 = vld [vmem:[%s3943_s25 + $0x290] sm:$0xff] }
  0x2d   : > { %v473_v45 = vld [vmem:[%s3943_s25 + $0x298] sm:$0xff]  ;;  %v4061_v46 = vsel %vm606_vm0, %v4044_v31, 0  ;;  %v180_v53 = vld [vmem:[%s3976_s28 + $0x30] sm:$0xff]  ;;  %v182_v56 = vld [vmem:[%s3976_s28 + $0x40] sm:$0xff] }
  0x2e   : > { %3500 = vmatpush3.bf16.xpose.msra.mxu1 %v734_v39  ;;  %v178_v39 = vld [vmem:[%s3976_s28 + $0x20] sm:$0xff]  ;;  %v181_v54 = vld [vmem:[%s3976_s28 + $0x38] sm:$0xff]  ;;  %v459_v58 = vld [vmem:[%s3943_s25 + $0x228] sm:$0xff] }
  0x2f   : > { %3212 = vmatpush3.bf16.xpose.msra.mxu0 %v686_v38  ;;  %3714 = vmatprep.subr.msk.bf16.mxu1 %vm606_vm0, %v553_v41  ;;  %v558_v38 = vpack.c.bf16 %v439_v34, %v438_v33  ;;  %v456_v41 = vld [vmem:[%s3943_s25 + $0x210] sm:$0xff]  ;;  %v458_v57 = vld [vmem:[%s3943_s25 + $0x220] sm:$0xff]  ;;  %v321_v59 = vpack.c.bf16 %v181_v54, %v180_v53  ;;  %v443_v3 = vld [vmem:[%s3943_s25 + $0x1a8] sm:$0xff] }
  0x30   : > { %3706 = vmatprep.subr.msk.bf16.mxu0 %vm606_vm0, %v545_v40  ;;  %v179_v40 = vld [vmem:[%s3976_s28 + $0x28] sm:$0xff]  ;;  %v568_v0 = vpack.c.bf16 %v459_v58, %v458_v57  ;;  %v442_v2 = vld [vmem:[%s3943_s25 + $0x1a0] sm:$0xff]  ;;  %v184_v5 = vld [vmem:[%s3976_s28 + $0x50] sm:$0xff] }
  0x31   : > { %v1322_v47 = vsel %vm606_vm0, %v558_v38, 0  ;;  %v320_v48 = vpack.c.bf16 %v179_v40, %v178_v39  ;;  %v185_v6 = vld [vmem:[%s3976_s28 + $0x58] sm:$0xff]  ;;  %v460_v11 = vld [vmem:[%s3943_s25 + $0x230] sm:$0xff]  ;;  %v190_v24 = vld [vmem:[%s3976_s28 + $0x80] sm:$0xff] }
  0x32   : > { %v461_v12 = vld [vmem:[%s3943_s25 + $0x238] sm:$0xff]  ;;  %v476_v14 = vld [vmem:[%s3943_s25 + $0x2b0] sm:$0xff]  ;;  %v191_v25 = vld [vmem:[%s3976_s28 + $0x88] sm:$0xff] }
  0x33   : > { %v477_v15 = vld [vmem:[%s3943_s25 + $0x2b8] sm:$0xff]  ;;  %v569_v17 = vpack.c.bf16 %v461_v12, %v460_v11  ;;  %v188_v22 = vld [vmem:[%s3976_s28 + $0x70] sm:$0xff]  ;;  %v462_v28 = vld [vmem:[%s3943_s25 + $0x240] sm:$0xff] }
  0x34   : > { %v189_v23 = vld [vmem:[%s3976_s28 + $0x78] sm:$0xff]  ;;  %v479_v33 = vld [vmem:[%s3943_s25 + $0x2c8] sm:$0xff]  ;;  %v446_v36 = vld [vmem:[%s3943_s25 + $0x1c0] sm:$0xff] }
  0x35   : > { %v4138_v27 = vpack.c.bf16 %v189_v23, %v188_v22  ;;  %v447_v38 = vld [vmem:[%s3943_s25 + $0x1c8] sm:$0xff]  ;;  %v481_v53 = vld [vmem:[%s3943_s25 + $0x2d8] sm:$0xff]  ;;  %v450_v11 = vld [vmem:[%s3943_s25 + $0x1e0] sm:$0xff] }
  0x36   : > { %3502 = vmatpush3.bf16.xpose.msra.mxu1 %v737_v50  ;;  %v440_v50 = vld [vmem:[%s3943_s25 + $0x190] sm:$0xff]  ;;  %v451_v12 = vld [vmem:[%s3943_s25 + $0x1e8] sm:$0xff] }
  0x37   : > { %3214 = vmatpush3.bf16.xpose.msra.mxu0 %v689_v49  ;;  %3715 = vmatprep.subr.msk.bf16.mxu1 %vm606_vm0, %v554_v52  ;;  %v567_v49 = vpack.c.bf16 %v457_v43, %v456_v41  ;;  %v4066_v52 = vpack.c.bf16 %v473_v45, %v472_v44  ;;  %v192_v41 = vld [vmem:[%s3976_s28 + $0x90] sm:$0xff]  ;;  %v194_v43 = vld [vmem:[%s3976_s28 + $0xa0] sm:$0xff]  ;;  %v195_v44 = vld [vmem:[%s3976_s28 + $0xa8] sm:$0xff]  ;;  %v562_v45 = vpack.c.bf16 %v447_v38, %v446_v36 }
  0x38   : > { %3707 = vmatprep.subr.msk.bf16.mxu0 %vm606_vm0, %v546_v51  ;;  %v441_v51 = vld [vmem:[%s3943_s25 + $0x198] sm:$0xff]  ;;  %v468_v23 = vld [vmem:[%s3943_s25 + $0x270] sm:$0xff] }
  0x39   : > { %v559_v55 = vpack.c.bf16 %v441_v51, %v440_v50  ;;  %v4092_v1 = vsel %vm606_vm0, %v4066_v52, 0  ;;  %v4176_v50 = vpack.c.bf16 %v195_v44, %v194_v43  ;;  %v480_v51 = vld [vmem:[%s3943_s25 + $0x2d0] sm:$0xff]  ;;  %v1334_v54 = vsel %vm606_vm0, %v562_v45, 0 }
  0x3a   : > { %v4191_v58 = vpack.c.bf16 %v481_v53, %v480_v51  ;;  %v204_v38 = vld [vmem:[%s3976_s28 + $0xf0] sm:$0xff]  ;;  %v209_v53 = vld [vmem:[%s3976_s28 + $0x118] sm:$0xff] }
  0x3b   : > { %v208_v51 = vld [vmem:[%s3976_s28 + $0x110] sm:$0xff] }
  0x3e   : > { %3504 = vmatpush3.bf16.xpose.msra.mxu1 %v740_v61  ;;  %v475_v61 = vld [vmem:[%s3943_s25 + $0x2a8] sm:$0xff] }
  0x3f   : > { %3216 = vmatpush3.bf16.xpose.msra.mxu0 %v692_v60  ;;  %3716 = vmatprep.subr.msk.bf16.mxu1 %vm606_vm0, %v555_v63  ;;  %v474_v60 = vld [vmem:[%s3943_s25 + $0x2a0] sm:$0xff] }
  0x40   : > { %3708 = vmatprep.subr.msk.bf16.mxu0 %vm606_vm0, %v547_v62  ;;  %v1325_v62 = vsel %vm606_vm0, %v559_v55, 0  ;;  %v4096_v4 = vpack.c.bf16 %v475_v61, %v474_v60  ;;  %v197_v60 = vld [vmem:[%s3976_s28 + $0xb8] sm:$0xff]  ;;  %v198_v61 = vld [vmem:[%s3976_s28 + $0xc0] sm:$0xff] }
  0x46   : > { %3506 = vmatpush3.bf16.xpose.msra.mxu1 %v743_v8  ;;  %v187_v8 = vld [vmem:[%s3976_s28 + $0x68] sm:$0xff] }
  0x47   : > { %3218 = vmatpush3.bf16.xpose.msra.mxu0 %v695_v7  ;;  %3717 = vmatprep.subr.msk.bf16.mxu1 %vm606_vm0, %v556_v10  ;;  %v186_v7 = vld [vmem:[%s3976_s28 + $0x60] sm:$0xff]  ;;  %v4107_v10 = vpack.c.bf16 %v185_v6, %v184_v5 }
  0x48   : > { %3709 = vmatprep.subr.msk.bf16.mxu0 %vm606_vm0, %v548_v9  ;;  %v560_v9 = vpack.c.bf16 %v443_v3, %v442_v2  ;;  %v4113_v13 = vpack.c.bf16 %v187_v8, %v186_v7  ;;  %v466_v2 = vld [vmem:[%s3943_s25 + $0x260] sm:$0xff]  ;;  %v467_v3 = vld [vmem:[%s3943_s25 + $0x268] sm:$0xff] }
  0x49   : > { %v482_v6 = vld [vmem:[%s3943_s25 + $0x2e0] sm:$0xff]  ;;  %v483_v7 = vld [vmem:[%s3943_s25 + $0x2e8] sm:$0xff] }
  0x4a   : > { %v1328_v16 = vsel %vm606_vm0, %v560_v9, 0  ;;  %v572_v9 = vpack.c.bf16 %v467_v3, %v466_v2  ;;  %v216_v3 = vld [vmem:[%s3976_s28 + $0x150] sm:$0xff] }
  0x4e   : > { %3508 = vmatpush3.bf16.xpose.msra.mxu1 %v746_v19  ;;  %v445_v19 = vld [vmem:[%s3943_s25 + $0x1b8] sm:$0xff] }
  0x4f   : > { %3220 = vmatpush3.bf16.xpose.msra.mxu0 %v698_v18  ;;  %3718 = vmatprep.subr.msk.bf16.mxu1 %vm606_vm0, %v557_v21  ;;  %v444_v18 = vld [vmem:[%s3943_s25 + $0x1b0] sm:$0xff]  ;;  %v4127_v21 = vpack.c.bf16 %v477_v15, %v476_v14  ;;  %v4222_v14 = vsel %vm606_vm0, %v4191_v58, 0  ;;  %v4224_v15 = vpack.c.bf16 %v483_v7, %v482_v6  ;;  %v217_v6 = vld [vmem:[%s3976_s28 + $0x158] sm:$0xff]  ;;  %v218_v7 = vld [vmem:[%s3976_s28 + $0x160] sm:$0xff] }
  0x50   : > { %3710 = vmatprep.subr.msk.bf16.mxu0 %vm606_vm0, %v549_v20  ;;  %v4125_v20 = vsel %vm606_vm0, %v4096_v4, 0  ;;  %v561_v26 = vpack.c.bf16 %v445_v19, %v444_v18  ;;  %v203_v18 = vld [vmem:[%s3976_s28 + $0xe8] sm:$0xff]  ;;  %v564_v19 = vpack.c.bf16 %v451_v12, %v450_v11  ;;  %v221_v12 = vld [vmem:[%s3976_s28 + $0x178] sm:$0xff] }
  0x51   : > { %v4156_v39 = vsel %vm606_vm0, %v4127_v21, 0 }
  0x52   : > { %v1331_v34 = vsel %vm606_vm0, %v561_v26, 0  ;;  %v484_v26 = vld [vmem:[%s3943_s25 + $0x2f0] sm:$0xff] }
  0x56   : > { %3510 = vmatpush3.bf16.xpose.msra.mxu1 %v749_v30  ;;  %v4144_v30 = vpack.c.bf16 %v191_v25, %v190_v24  ;;  %v469_v24 = vld [vmem:[%s3943_s25 + $0x278] sm:$0xff] }
  0x57   : > { %3222 = vmatpush3.bf16.xpose.msra.mxu0 %v701_v29  ;;  %3719 = vmatprep.subr.msk.bf16.mxu1 %vm606_vm0, %v566_v32  ;;  %v463_v29 = vld [vmem:[%s3943_s25 + $0x248] sm:$0xff]  ;;  %v478_v32 = vld [vmem:[%s3943_s25 + $0x2c0] sm:$0xff] }
  0x58   : > { %3727 = vmatprep.subr.msk.bf16.mxu0 %vm606_vm0, %v4044_v31  ;;  %v570_v35 = vpack.c.bf16 %v463_v29, %v462_v28  ;;  %v4158_v40 = vpack.c.bf16 %v479_v33, %v478_v32  ;;  %v485_v28 = vld [vmem:[%s3943_s25 + $0x2f8] sm:$0xff]  ;;  %v1340_v29 = vsel %vm606_vm0, %v564_v19, 0  ;;  %v573_v32 = vpack.c.bf16 %v469_v24, %v468_v23  ;;  %v452_v33 = vld [vmem:[%s3943_s25 + $0x1f0] sm:$0xff]  ;;  %v227_v24 = vld [vmem:[%s3976_s28 + $0x1a8] sm:$0xff] }
  0x59   : > { %v4257_v36 = vpack.c.bf16 %v485_v28, %v484_v26  ;;  %v225_v19 = vld [vmem:[%s3976_s28 + $0x198] sm:$0xff]  ;;  %v235_v28 = vld [vmem:[%s3976_s28 + $0x1e8] sm:$0xff] }
  0x5a   : > { %v4189_v57 = vsel %vm606_vm0, %v4158_v40, 0 }
  0x5d   : > { %3512 = vmatmul.mubr.msk.bf16.vlgmr.msra.gmra.mrb[0].mxu1 %vm606_vm0, %v319_v42 }
  0x5e   : > { %3224 = vmatmul.mubr.msk.bf16.vlgmr.msra.gmra.mrb[0].mxu0 %vm606_vm0, %v3986_v37  ;;  %3304 = vmatpush3.bf16.xpose.msra.mxu1 %v1322_v47  ;;  %v183_v37 = vld [vmem:[%s3976_s28 + $0x48] sm:$0xff] }
  0x5f   : > { %3560 = vmatpush3.bf16.xpose.msra.mxu0 %v4061_v46  ;;  %3225 = vmatprep.mubr.msk.bf16.mxu0 %vm606_vm0, %v319_v42  ;;  %v4086_v63 = vpack.c.bf16 %v183_v37, %v182_v56  ;;  %v448_v56 = vld [vmem:[%s3943_s25 + $0x1d0] sm:$0xff]  ;;  %v449_v37 = vld [vmem:[%s3943_s25 + $0x1d8] sm:$0xff] }
  0x60   : > { %3515 = vmatprep.mubr.msk.bf16.mxu1 %vm606_vm0, %v320_v48  ;;  %3720 = vmatprep.subr.msk.bf16.mxu1 %vm606_vm0, %v567_v49  ;;  %v465_v49 = vld [vmem:[%s3943_s25 + $0x258] sm:$0xff] }
  0x61   : > { %3729 = vmatprep.subr.msk.bf16.mxu0 %vm606_vm0, %v4066_v52 }
  0x65   : > { %3516 = vmatmul.mubr.msk.bf16.gmra.mrb[4].mxu1 %vm606_vm0, %v321_v59 }
  0x66   : > { %3226 = vmatmul.mubr.msk.bf16.gmra.mrb[4].mxu0 %vm606_vm0, %v319_v42  ;;  %3306 = vmatpush3.bf16.xpose.msra.mxu1 %v1325_v62  ;;  %v193_v42 = vld [vmem:[%s3976_s28 + $0x98] sm:$0xff]  ;;  %v199_v62 = vld [vmem:[%s3976_s28 + $0xc8] sm:$0xff] }
  0x67   : > { %3227 = vmatprep.mubr.msk.bf16.mxu0 %vm606_vm0, %v320_v48  ;;  %3519 = vmatprep.mubr.msk.bf16.mxu1 %vm606_vm0, %v4086_v63  ;;  %v4170_v47 = vpack.c.bf16 %v193_v42, %v192_v41  ;;  %v4209_v5 = vpack.c.bf16 %v199_v62, %v198_v61  ;;  %v205_v41 = vld [vmem:[%s3976_s28 + $0xf8] sm:$0xff]  ;;  %v207_v42 = vld [vmem:[%s3976_s28 + $0x108] sm:$0xff]  ;;  %v214_v62 = vld [vmem:[%s3976_s28 + $0x140] sm:$0xff] }
  0x68   : > { %3721 = vmatprep.subr.msk.bf16.mxu1 %vm606_vm0, %v568_v0  ;;  %3562 = vmatpush3.bf16.xpose.msra.mxu0 %v4092_v1  ;;  %v4269_v44 = vpack.c.bf16 %v205_v41, %v204_v38  ;;  %v213_v61 = vld [vmem:[%s3976_s28 + $0x138] sm:$0xff]  ;;  %v519_v38 = vld [vmem:[%s3943_s25 + $0x408] sm:$0xff] }
  0x69   : > { %3731 = vmatprep.subr.msk.bf16.mxu0 %vm606_vm0, %v4096_v4 }
  0x6d   : > { %3520 = vmatmul.mubr.msk.bf16.gmra.mrb[8].mxu1 %vm606_vm0, %v4107_v10 }
  0x6e   : > { %3228 = vmatmul.mubr.msk.bf16.gmra.mrb[8].mxu0 %vm606_vm0, %v320_v48  ;;  %3523 = vmatprep.mubr.msk.bf16.mxu1 %vm606_vm0, %v4113_v13  ;;  %v464_v48 = vld [vmem:[%s3943_s25 + $0x250] sm:$0xff] }
  0x6f   : > { %3229 = vmatprep.mubr.msk.bf16.mxu0 %vm606_vm0, %v321_v59  ;;  %3308 = vmatpush3.bf16.xpose.msra.mxu1 %v1328_v16  ;;  %v571_v55 = vpack.c.bf16 %v465_v49, %v464_v48  ;;  %v201_v16 = vld [vmem:[%s3976_s28 + $0xd8] sm:$0xff]  ;;  %v4282_v49 = vsel %vm606_vm0, %v4257_v36, 0 }
  0x70   : > { %3722 = vmatprep.subr.msk.bf16.mxu1 %vm606_vm0, %v569_v17  ;;  %3564 = vmatpush3.bf16.xpose.msra.mxu0 %v4125_v20  ;;  %v202_v17 = vld [vmem:[%s3976_s28 + $0xe0] sm:$0xff] }
  0x71   : > { %3733 = vmatprep.subr.msk.bf16.mxu0 %vm606_vm0, %v4127_v21  ;;  %v4242_v25 = vpack.c.bf16 %v203_v18, %v202_v17 }
  0x75   : > { %3524 = vmatmul.mubr.msk.bf16.gmra.mrb[12].mxu1 %vm606_vm0, %v4138_v27 }
  0x76   : > { %3230 = vmatmul.mubr.msk.bf16.gmra.mrb[12].mxu0 %vm606_vm0, %v321_v59  ;;  %3527 = vmatprep.mubr.msk.bf16.mxu1 %vm606_vm0, %v4144_v30  ;;  %v196_v59 = vld [vmem:[%s3976_s28 + $0xb0] sm:$0xff] }
  0x77   : > { %3231 = vmatprep.mubr.msk.bf16.mxu0 %vm606_vm0, %v4086_v63  ;;  %3310 = vmatpush3.bf16.xpose.msra.mxu1 %v1331_v34  ;;  %v4203_v0 = vpack.c.bf16 %v197_v60, %v196_v59  ;;  %v453_v34 = vld [vmem:[%s3943_s25 + $0x1f8] sm:$0xff]  ;;  %v503_v59 = vld [vmem:[%s3943_s25 + $0x388] sm:$0xff] }
  0x78   : > { %3723 = vmatprep.subr.msk.bf16.mxu1 %vm606_vm0, %v570_v35  ;;  %3566 = vmatpush3.bf16.xpose.msra.mxu0 %v4156_v39  ;;  %v4255_v35 = vsel %vm606_vm0, %v4224_v15, 0  ;;  %v565_v43 = vpack.c.bf16 %v453_v34, %v452_v33  ;;  %v240_v33 = vld [vmem:[%s3976_s28 + $0x210] sm:$0xff]  ;;  %v241_v34 = vld [vmem:[%s3976_s28 + $0x218] sm:$0xff] }
  0x79   : > { %3735 = vmatprep.subr.msk.bf16.mxu0 %vm606_vm0, %v4158_v40 }
  0x7a   : > { %v1343_v48 = vsel %vm606_vm0, %v565_v43, 0 }
  0x7d   : > { %3528 = vmatmul.mubr.msk.bf16.gmra.mrb[16].mxu1 %vm606_vm0, %v4170_v47 }
  0x7e   : > { %3232 = vmatmul.mubr.msk.bf16.gmra.mrb[16].mxu0 %vm606_vm0, %v4086_v63  ;;  %3531 = vmatprep.mubr.msk.bf16.mxu1 %vm606_vm0, %v4176_v50  ;;  %v563_v63 = vpack.c.bf16 %v449_v37, %v448_v56  ;;  %v502_v37 = vld [vmem:[%s3943_s25 + $0x380] sm:$0xff] }
  0x7f   : > { %3233 = vmatprep.mubr.msk.bf16.mxu0 %vm606_vm0, %v4107_v10  ;;  %3312 = vmatpush3.bf16.xpose.msra.mxu1 %v1334_v54  ;;  %v210_v54 = vld [vmem:[%s3976_s28 + $0x120] sm:$0xff]  ;;  %v590_v60 = vpack.c.bf16 %v503_v59, %v502_v37  ;;  %v249_v37 = vld [vmem:[%s3976_s28 + $0x258] sm:$0xff]  ;;  %v504_v59 = vld [vmem:[%s3943_s25 + $0x390] sm:$0xff] }
  0x80   : > { %3724 = vmatprep.subr.msk.bf16.mxu1 %vm606_vm0, %v571_v55  ;;  %3568 = vmatpush3.bf16.xpose.msra.mxu0 %v4189_v57  ;;  %v1337_v8 = vsel %vm606_vm0, %v563_v63, 0  ;;  %v4295_v55 = vpack.c.bf16 %v209_v53, %v208_v51  ;;  %v215_v63 = vld [vmem:[%s3976_s28 + $0x148] sm:$0xff] }
  0x81   : > { %3737 = vmatprep.subr.msk.bf16.mxu0 %vm606_vm0, %v4191_v58  ;;  %v247_v51 = vld [vmem:[%s3976_s28 + $0x248] sm:$0xff] }
  0x85   : > { %3532 = vmatmul.mubr.msk.bf16.gmra.mrb[20].mxu1 %vm606_vm0, %v4203_v0 }
  0x86   : > { %3234 = vmatmul.mubr.msk.bf16.gmra.mrb[20].mxu0 %vm606_vm0, %v4107_v10  ;;  %3535 = vmatprep.mubr.msk.bf16.mxu1 %vm606_vm0, %v4209_v5  ;;  %v200_v10 = vld [vmem:[%s3976_s28 + $0xd0] sm:$0xff] }
  0x87   : > { %3235 = vmatprep.mubr.msk.bf16.mxu0 %vm606_vm0, %v4113_v13  ;;  %3314 = vmatpush3.bf16.xpose.msra.mxu1 %v1337_v8  ;;  %v4236_v22 = vpack.c.bf16 %v201_v16, %v200_v10  ;;  %v219_v8 = vld [vmem:[%s3976_s28 + $0x168] sm:$0xff]  ;;  %v222_v10 = vld [vmem:[%s3976_s28 + $0x180] sm:$0xff] }
  0x88   : > { %3725 = vmatprep.subr.msk.bf16.mxu1 %vm606_vm0, %v572_v9  ;;  %3570 = vmatpush3.bf16.xpose.msra.mxu0 %v4222_v14  ;;  %v4330_v9 = vpack.c.bf16 %v217_v6, %v216_v3  ;;  %v4332_v11 = vpack.c.bf16 %v219_v8, %v218_v7  ;;  %v223_v16 = vld [vmem:[%s3976_s28 + $0x188] sm:$0xff]  ;;  %v250_v3 = vld [vmem:[%s3976_s28 + $0x260] sm:$0xff] }
  0x89   : > { %3739 = vmatprep.subr.msk.bf16.mxu0 %vm606_vm0, %v4224_v15  ;;  %v4348_v18 = vpack.c.bf16 %v223_v16, %v222_v10  ;;  %v251_v6 = vld [vmem:[%s3976_s28 + $0x268] sm:$0xff]  ;;  %v506_v7 = vld [vmem:[%s3943_s25 + $0x3a0] sm:$0xff] }
  0x8a   : > { %v507_v8 = vld [vmem:[%s3943_s25 + $0x3a8] sm:$0xff] }
  0x8b   : > { %v491_v10 = vld [vmem:[%s3943_s25 + $0x328] sm:$0xff] }
  0x8d   : > { %3536 = vmatmul.mubr.msk.bf16.gmra.mrb[24].mxu1 %vm606_vm0, %v4236_v22 }
  0x8e   : > { %3236 = vmatmul.mubr.msk.bf16.gmra.mrb[24].mxu0 %vm606_vm0, %v4113_v13  ;;  %3539 = vmatprep.mubr.msk.bf16.mxu1 %vm606_vm0, %v4242_v25  ;;  %v206_v13 = vld [vmem:[%s3976_s28 + $0x100] sm:$0xff] }
  0x8f   : > { %3237 = vmatprep.mubr.msk.bf16.mxu0 %vm606_vm0, %v4138_v27  ;;  %3316 = vmatpush3.bf16.xpose.msra.mxu1 %v1340_v29  ;;  %v4273_v45 = vpack.c.bf16 %v207_v42, %v206_v13  ;;  %v237_v29 = vld [vmem:[%s3976_s28 + $0x1f8] sm:$0xff]  ;;  %v242_v13 = vld [vmem:[%s3976_s28 + $0x220] sm:$0xff]  ;;  %v243_v42 = vld [vmem:[%s3976_s28 + $0x228] sm:$0xff] }
  0x90   : > { %3726 = vmatprep.subr.msk.bf16.mxu1 %vm606_vm0, %v573_v32  ;;  %3572 = vmatpush3.bf16.xpose.msra.mxu0 %v4255_v35  ;;  %v239_v32 = vld [vmem:[%s3976_s28 + $0x208] sm:$0xff]  ;;  %v4496_v43 = vpack.c.bf16 %v243_v42, %v242_v13  ;;  %v256_v13 = vld [vmem:[%s3976_s28 + $0x290] sm:$0xff]  ;;  %v257_v42 = vld [vmem:[%s3976_s28 + $0x298] sm:$0xff] }
  0x91   : > { %3741 = vmatprep.subr.msk.bf16.mxu0 %vm606_vm0, %v4257_v36 }
  0x95   : > { %3540 = vmatmul.mubr.msk.bf16.gmra.mrb[28].mxu1 %vm606_vm0, %v4269_v44 }
  0x96   : > { %3238 = vmatmul.mubr.msk.bf16.gmra.mrb[28].mxu0 %vm606_vm0, %v4138_v27  ;;  %3543 = vmatprep.mubr.msk.bf16.mxu1 %vm606_vm0, %v4273_v45  ;;  %v211_v27 = vld [vmem:[%s3976_s28 + $0x128] sm:$0xff] }
  0x97   : > { %3239 = vmatprep.mubr.msk.bf16.mxu0 %vm606_vm0, %v4144_v30  ;;  %3318 = vmatpush3.bf16.xpose.msra.mxu1 %v1343_v48  ;;  %v4297_v56 = vpack.c.bf16 %v211_v27, %v210_v54  ;;  %v486_v54 = vld [vmem:[%s3943_s25 + $0x300] sm:$0xff]  ;;  %v487_v27 = vld [vmem:[%s3943_s25 + $0x308] sm:$0xff] }
  0x98   : > { %3728 = vmatprep.subr.msk.bf16.mxu1 %vm606_vm0, %v4044_v31  ;;  %3574 = vmatpush3.bf16.xpose.msra.mxu0 %v4282_v49  ;;  %v212_v31 = vld [vmem:[%s3976_s28 + $0x130] sm:$0xff] }
  0x99   : > { %3743 = vmatprep.subr.msk.bf16.mxu0 %vm606_vm0, %v590_v60  ;;  %v4314_v2 = vpack.c.bf16 %v213_v61, %v212_v31  ;;  %v505_v60 = vld [vmem:[%s3943_s25 + $0x398] sm:$0xff] }
  0x9d   : > { %3544 = vmatmul.mubr.msk.bf16.gmra.mrb[32].mxu1 %vm606_vm0, %v4295_v55 }
  0x9e   : > { %3240 = vmatmul.mubr.msk.bf16.gmra.mrb[32].mxu0 %vm606_vm0, %v4144_v30  ;;  %3547 = vmatprep.mubr.msk.bf16.mxu1 %vm606_vm0, %v4297_v56  ;;  %v4316_v30 = vpack.c.bf16 %v215_v63, %v214_v62  ;;  %v591_v62 = vpack.c.bf16 %v505_v60, %v504_v59  ;;  %v488_v63 = vld [vmem:[%s3943_s25 + $0x310] sm:$0xff] }
  0x9f   : > { %3241 = vmatprep.mubr.msk.bf16.mxu0 %vm606_vm0, %v4170_v47 }
  0xa5   : > { %3548 = vmatmul.mubr.msk.bf16.gmra.mrb[36].mxu1 %vm606_vm0, %v4314_v2 }
  0xa6   : > { %3242 = vmatmul.mubr.msk.bf16.gmra.mrb[36].mxu0 %vm606_vm0, %v4170_v47  ;;  %3551 = vmatprep.mubr.msk.bf16.mxu1 %vm606_vm0, %v4316_v30  ;;  %v220_v47 = vld [vmem:[%s3976_s28 + $0x170] sm:$0xff] }
  0xa7   : > { %3243 = vmatprep.mubr.msk.bf16.mxu0 %vm606_vm0, %v4176_v50  ;;  %v4346_v17 = vpack.c.bf16 %v221_v12, %v220_v47  ;;  %v592_v47 = vpack.c.bf16 %v507_v8, %v506_v7  ;;  %v490_v12 = vld [vmem:[%s3943_s25 + $0x320] sm:$0xff] }
  0xa8   : > { %v584_v16 = vpack.c.bf16 %v491_v10, %v490_v12  ;;  %v514_v7 = vld [vmem:[%s3943_s25 + $0x3e0] sm:$0xff] }
  0xad   : > { %3552 = vmatmul.mubr.msk.bf16.gmra.mrb[40].mxu1 %vm606_vm0, %v4330_v9 }
  0xae   : > { %3244 = vmatmul.mubr.msk.bf16.gmra.mrb[40].mxu0 %vm606_vm0, %v4176_v50  ;;  %3555 = vmatprep.mubr.msk.bf16.mxu1 %vm606_vm0, %v4332_v11  ;;  %v224_v50 = vld [vmem:[%s3976_s28 + $0x190] sm:$0xff] }
  0xaf   : > { %3245 = vmatprep.mubr.msk.bf16.mxu0 %vm606_vm0, %v4203_v0  ;;  %v4360_v23 = vpack.c.bf16 %v225_v19, %v224_v50  ;;  %v508_v50 = vld [vmem:[%s3943_s25 + $0x3b0] sm:$0xff]  ;;  %v509_v19 = vld [vmem:[%s3943_s25 + $0x3b8] sm:$0xff] }
  0xb5   : > { %3556 = vmatmul.mubr.msk.bf16.gmra.mrb[44].mxu1 %vm606_vm0, %v4346_v17 }
  0xb6   : > { %3246 = vmatmul.mubr.msk.bf16.gmra.mrb[44].mxu0 %vm606_vm0, %v4203_v0  ;;  %3319 = vmatprep.mubr.msk.bf16.mxu1 %vm606_vm0, %v4348_v18  ;;  %v226_v0 = vld [vmem:[%s3976_s28 + $0x1a0] sm:$0xff] }
  0xb7   : > { %3247 = vmatprep.mubr.msk.bf16.mxu0 %vm606_vm0, %v4209_v5  ;;  %v4375_v26 = vpack.c.bf16 %v227_v24, %v226_v0  ;;  %v1970_v0 = vsel %vm606_vm0, %v584_v16, 0  ;;  %v593_v24 = vpack.c.bf16 %v509_v19, %v508_v50  ;;  %v498_v50 = vld [vmem:[%s3943_s25 + $0x360] sm:$0xff]  ;;  %v499_v19 = vld [vmem:[%s3943_s25 + $0x368] sm:$0xff] }
  0xbd   : > { %3320 = vmatmul.mubr.msk.bf16.vlgmr.msra.gmra.mrb[48].mxu1 %vm606_vm0, %v4348_v18 }
  0xbe   : > { %3248 = vmatmul.mubr.msk.bf16.gmra.mrb[48].mxu0 %vm606_vm0, %v4209_v5  ;;  %3695 = vmatpush3.bf16.xpose.msra.mxu1 %v4061_v46  ;;  %v228_v46 = vld [vmem:[%s3976_s28 + $0x1b0] sm:$0xff]  ;;  %v229_v5 = vld [vmem:[%s3976_s28 + $0x1b8] sm:$0xff] }
  0xbf   : > { %3249 = vmatprep.mubr.msk.bf16.mxu0 %vm606_vm0, %v4236_v22  ;;  %3321 = vmatprep.mubr.msk.bf16.mxu1 %vm606_vm0, %v4360_v23 }
  0xc0   : > { %3730 = vmatprep.subr.msk.bf16.mxu1 %vm606_vm0, %v4066_v52  ;;  %v4390_v52 = vpack.c.bf16 %v229_v5, %v228_v46  ;;  %v493_v46 = vld [vmem:[%s3943_s25 + $0x338] sm:$0xff] }
  0xc5   : > { %3322 = vmatmul.mubr.msk.bf16.gmra.mrb[52].mxu1 %vm606_vm0, %v4360_v23 }
  0xc6   : > { %3250 = vmatmul.mubr.msk.bf16.gmra.mrb[52].mxu0 %vm606_vm0, %v4236_v22  ;;  %3323 = vmatprep.mubr.msk.bf16.mxu1 %vm606_vm0, %v4375_v26  ;;  %v231_v22 = vld [vmem:[%s3976_s28 + $0x1c8] sm:$0xff] }
  0xc7   : > { %3251 = vmatprep.mubr.msk.bf16.mxu0 %vm606_vm0, %v4242_v25  ;;  %3696 = vmatpush3.bf16.xpose.msra.mxu1 %v4092_v1  ;;  %v230_v1 = vld [vmem:[%s3976_s28 + $0x1c0] sm:$0xff] }
  0xc8   : > { %3732 = vmatprep.subr.msk.bf16.mxu1 %vm606_vm0, %v4096_v4  ;;  %v4405_v4 = vpack.c.bf16 %v231_v22, %v230_v1  ;;  %v255_v1 = vld [vmem:[%s3976_s28 + $0x288] sm:$0xff] }
  0xcd   : > { %3324 = vmatmul.mubr.msk.bf16.gmra.mrb[56].mxu1 %vm606_vm0, %v4375_v26 }
  0xce   : > { %3252 = vmatmul.mubr.msk.bf16.gmra.mrb[56].mxu0 %vm606_vm0, %v4242_v25  ;;  %3325 = vmatprep.mubr.msk.bf16.mxu1 %vm606_vm0, %v4390_v52  ;;  %v233_v25 = vld [vmem:[%s3976_s28 + $0x1d8] sm:$0xff] }
  0xcf   : > { %3253 = vmatprep.mubr.msk.bf16.mxu0 %vm606_vm0, %v4269_v44  ;;  %3697 = vmatpush3.bf16.xpose.msra.mxu1 %v4125_v20  ;;  %v232_v20 = vld [vmem:[%s3976_s28 + $0x1d0] sm:$0xff] }
  0xd0   : > { %3734 = vmatprep.subr.msk.bf16.mxu1 %vm606_vm0, %v4127_v21  ;;  %v4420_v21 = vpack.c.bf16 %v233_v25, %v232_v20  ;;  %v510_v20 = vld [vmem:[%s3943_s25 + $0x3c0] sm:$0xff]  ;;  %v511_v25 = vld [vmem:[%s3943_s25 + $0x3c8] sm:$0xff] }
  0xd5   : > { %3326 = vmatmul.mubr.msk.bf16.gmra.mrb[60].mxu1 %vm606_vm0, %v4390_v52 }
  0xd6   : > { %3254 = vmatmul.mubr.msk.bf16.gmra.mrb[60].mxu0 %vm606_vm0, %v4269_v44  ;;  %3327 = vmatprep.mubr.msk.bf16.mxu1 %vm606_vm0, %v4405_v4  ;;  %v244_v44 = vld [vmem:[%s3976_s28 + $0x230] sm:$0xff] }
  0xd7   : > { %3255 = vmatprep.mubr.msk.bf16.mxu0 %vm606_vm0, %v4273_v45  ;;  %3698 = vmatpush3.bf16.xpose.msra.mxu1 %v4156_v39  ;;  %v234_v39 = vld [vmem:[%s3976_s28 + $0x1e0] sm:$0xff] }
  0xd8   : > { %3736 = vmatprep.subr.msk.bf16.mxu1 %vm606_vm0, %v4158_v40  ;;  %v4435_v40 = vpack.c.bf16 %v235_v28, %v234_v39 }
  0xdd   : > { %3328 = vmatmul.mubr.msk.bf16.gmra.mrb[64].mxu1 %vm606_vm0, %v4405_v4 }
  0xde   : > { %3256 = vmatmul.mubr.msk.bf16.gmra.mrb[64].mxu0 %vm606_vm0, %v4273_v45  ;;  %3329 = vmatprep.mubr.msk.bf16.mxu1 %vm606_vm0, %v4420_v21  ;;  %v245_v45 = vld [vmem:[%s3976_s28 + $0x238] sm:$0xff] }
  0xdf   : > { %3257 = vmatprep.mubr.msk.bf16.mxu0 %vm606_vm0, %v4295_v55  ;;  %3699 = vmatpush3.bf16.xpose.msra.mxu1 %v4189_v57  ;;  %v236_v57 = vld [vmem:[%s3976_s28 + $0x1f0] sm:$0xff]  ;;  %v4508_v48 = vpack.c.bf16 %v245_v45, %v244_v44 }
  0xe0   : > { %3738 = vmatprep.subr.msk.bf16.mxu1 %vm606_vm0, %v4191_v58  ;;  %v4450_v58 = vpack.c.bf16 %v237_v29, %v236_v57 }
  0xe5   : > { %3330 = vmatmul.mubr.msk.bf16.gmra.mrb[68].mxu1 %vm606_vm0, %v4420_v21 }
  0xe6   : > { %3258 = vmatmul.mubr.msk.bf16.gmra.mrb[68].mxu0 %vm606_vm0, %v4295_v55  ;;  %3331 = vmatprep.mubr.msk.bf16.mxu1 %vm606_vm0, %v4435_v40  ;;  %v582_v55 = vpack.c.bf16 %v487_v27, %v486_v54 }
  0xe7   : > { %3259 = vmatprep.mubr.msk.bf16.mxu0 %vm606_vm0, %v4297_v56  ;;  %3700 = vmatpush3.bf16.xpose.msra.mxu1 %v4222_v14  ;;  %v238_v14 = vld [vmem:[%s3976_s28 + $0x200] sm:$0xff] }
  0xe8   : > { %3740 = vmatprep.subr.msk.bf16.mxu1 %vm606_vm0, %v4224_v15  ;;  %v4465_v15 = vpack.c.bf16 %v239_v32, %v238_v14  ;;  %v1964_v61 = vsel %vm606_vm0, %v582_v55, 0  ;;  %v4625_v55 = vpack.c.bf16 %v257_v42, %v256_v13 }
  0xed   : > { %3332 = vmatmul.mubr.msk.bf16.gmra.mrb[72].mxu1 %vm606_vm0, %v4435_v40 }
  0xee   : > { %3260 = vmatmul.mubr.msk.bf16.gmra.mrb[72].mxu0 %vm606_vm0, %v4297_v56  ;;  %3333 = vmatprep.mubr.msk.bf16.mxu1 %vm606_vm0, %v4450_v58  ;;  %v248_v56 = vld [vmem:[%s3976_s28 + $0x250] sm:$0xff] }
  0xef   : > { %3261 = vmatprep.mubr.msk.bf16.mxu0 %vm606_vm0, %v4314_v2  ;;  %3701 = vmatpush3.bf16.xpose.msra.mxu1 %v4255_v35  ;;  %v518_v35 = vld [vmem:[%s3943_s25 + $0x400] sm:$0xff]  ;;  %v4536_v31 = vpack.c.bf16 %v249_v37, %v248_v56 }
  0xf0   : > { %3742 = vmatprep.subr.msk.bf16.mxu1 %vm606_vm0, %v4257_v36  ;;  %v4479_v36 = vpack.c.bf16 %v241_v34, %v240_v33  ;;  %v4482_v41 = vpack.c.bf16 %v519_v38, %v518_v35  ;;  %v594_v33 = vpack.c.bf16 %v511_v25, %v510_v20  ;;  %v494_v34 = vld [vmem:[%s3943_s25 + $0x340] sm:$0xff]  ;;  %v495_v35 = vld [vmem:[%s3943_s25 + $0x348] sm:$0xff] }
  0xf1   : > { %v586_v38 = vpack.c.bf16 %v495_v35, %v494_v34 }
  0xf3   : > { %v1976_v59 = vsel %vm606_vm0, %v586_v38, 0  ;;  %v270_v38 = vld [vmem:[%s3976_s28 + $0x300] sm:$0xff] }
  0xf5   : > { %3334 = vmatmul.mubr.msk.bf16.gmra.mrb[76].mxu1 %vm606_vm0, %v4450_v58 }
  0xf6   : > { %3262 = vmatmul.mubr.msk.bf16.gmra.mrb[76].mxu0 %vm606_vm0, %v4314_v2  ;;  %3335 = vmatprep.mubr.msk.bf16.mxu1 %vm606_vm0, %v4465_v15  ;;  %v489_v2 = vld [vmem:[%s3943_s25 + $0x318] sm:$0xff] }
  0xf7   : > { %3263 = vmatprep.mubr.msk.bf16.mxu0 %vm606_vm0, %v4316_v30  ;;  %3702 = vmatpush3.bf16.xpose.msra.mxu1 %v4282_v49  ;;  %v246_v49 = vld [vmem:[%s3976_s28 + $0x240] sm:$0xff] }
  0xf8   : > { %3751 = vmatprep.subr.msk.bf16.mxu1 %vm606_vm0, %v4482_v41  ;;  %v4520_v53 = vpack.c.bf16 %v247_v51, %v246_v49  ;;  %v512_v49 = vld [vmem:[%s3943_s25 + $0x3d0] sm:$0xff] }
  0xfd   : > { %3336 = vmatmul.mubr.msk.bf16.gmra.mrb[80].mxu1 %vm606_vm0, %v4465_v15 }
  0xfe   : > { %3264 = vmatmul.mubr.msk.bf16.gmra.mrb[80].mxu0 %vm606_vm0, %v4316_v30  ;;  %3337 = vmatprep.mubr.msk.bf16.mxu1 %vm606_vm0, %v4479_v36  ;;  %v583_v30 = vpack.c.bf16 %v489_v2, %v488_v63  ;;  %v258_v2 = vld [vmem:[%s3976_s28 + $0x2a0] sm:$0xff] }
  0xff   : > { %3265 = vmatprep.mubr.msk.bf16.mxu0 %vm606_vm0, %v4330_v9 }
 0x105   : > { %3338 = vmatmul.mubr.msk.bf16.gmra.mrb[84].mxu1 %vm606_vm0, %v4479_v36 }
 0x106   : > { %3266 = vmatmul.mubr.msk.bf16.gmra.mrb[84].mxu0 %vm606_vm0, %v4330_v9  ;;  %3339 = vmatprep.mubr.msk.bf16.mxu1 %vm606_vm0, %v4496_v43  ;;  %v4554_v9 = vpack.c.bf16 %v251_v6, %v250_v3 }
 0x107   : > { %3267 = vmatprep.mubr.msk.bf16.mxu0 %vm606_vm0, %v4332_v11 }
 0x10d   : > { %3340 = vmatmul.mubr.msk.bf16.gmra.mrb[88].mxu1 %vm606_vm0, %v4496_v43 }
 0x10e   : > { %3268 = vmatmul.mubr.msk.bf16.gmra.mrb[88].mxu0 %vm606_vm0, %v4332_v11  ;;  %3341 = vmatprep.mubr.msk.bf16.mxu1 %vm606_vm0, %v4508_v48  ;;  %v1967_v11 = vsel %vm606_vm0, %v583_v30, 0  ;;  %v259_v30 = vld [vmem:[%s3976_s28 + $0x2a8] sm:$0xff] }
 0x10f   : > { %3269 = vmatprep.mubr.msk.bf16.mxu0 %vm606_vm0, %v4346_v17  ;;  %v4651_v12 = vpack.c.bf16 %v259_v30, %v258_v2 }
 0x115   : > { %3342 = vmatmul.mubr.msk.bf16.gmra.mrb[92].mxu1 %vm606_vm0, %v4508_v48 }
 0x116   : > { %3270 = vmatmul.mubr.msk.bf16.gmra.mrb[92].mxu0 %vm606_vm0, %v4346_v17  ;;  %3343 = vmatprep.mubr.msk.bf16.mxu1 %vm606_vm0, %v4520_v53  ;;  %v252_v17 = vld [vmem:[%s3976_s28 + $0x270] sm:$0xff] }
 0x117   : > { %3575 = vmatprep.mubr.msk.bf16.mxu0 %vm606_vm0, %v4348_v18  ;;  %v253_v18 = vld [vmem:[%s3976_s28 + $0x278] sm:$0xff] }
 0x11d   : > { %3344 = vmatmul.mubr.msk.bf16.gmra.mrb[96].mxu1 %vm606_vm0, %v4520_v53 }
 0x11e   : > { %3576 = vmatmul.mubr.msk.bf16.vlgmr.msra.gmra.mrb[96].mxu0 %vm606_vm0, %v4360_v23  ;;  %3345 = vmatprep.mubr.msk.bf16.mxu1 %vm606_vm0, %v4536_v31  ;;  %v4575_v23 = vpack.c.bf16 %v253_v18, %v252_v17 }
 0x11f   : > { %3400 = vmatpush3.bf16.xpose.msra.mxu0 %v1964_v61  ;;  %3579 = vmatprep.mubr.msk.bf16.mxu0 %vm606_vm0, %v4375_v26  ;;  %v492_v26 = vld [vmem:[%s3943_s25 + $0x330] sm:$0xff] }
 0x120   : > { %3744 = vmatprep.subr.msk.bf16.mxu0 %vm606_vm0, %v591_v62  ;;  %v585_v5 = vpack.c.bf16 %v493_v46, %v492_v26  ;;  %v496_v61 = vld [vmem:[%s3943_s25 + $0x350] sm:$0xff]  ;;  %v497_v62 = vld [vmem:[%s3943_s25 + $0x358] sm:$0xff] }
 0x121   : > { %v587_v63 = vpack.c.bf16 %v497_v62, %v496_v61  ;;  %v261_v26 = vld [vmem:[%s3976_s28 + $0x2b8] sm:$0xff] }
 0x122   : > { %v1973_v32 = vsel %vm606_vm0, %v585_v5, 0 }
 0x123   : > { %v1979_v17 = vsel %vm606_vm0, %v587_v63, 0 }
 0x125   : > { %3346 = vmatmul.mubr.msk.bf16.gmra.mrb[100].mxu1 %vm606_vm0, %v4536_v31 }
 0x126   : > { %3580 = vmatmul.mubr.msk.bf16.gmra.mrb[100].mxu0 %vm606_vm0, %v4390_v52  ;;  %3347 = vmatprep.mubr.msk.bf16.mxu1 %vm606_vm0, %v4554_v9  ;;  %v254_v52 = vld [vmem:[%s3976_s28 + $0x280] sm:$0xff] }
 0x127   : > { %3402 = vmatpush3.bf16.xpose.msra.mxu0 %v1967_v11  ;;  %3583 = vmatprep.mubr.msk.bf16.mxu0 %vm606_vm0, %v4405_v4  ;;  %v4599_v57 = vpack.c.bf16 %v255_v1, %v254_v52  ;;  %v516_v52 = vld [vmem:[%s3943_s25 + $0x3f0] sm:$0xff] }
 0x128   : > { %3745 = vmatprep.subr.msk.bf16.mxu0 %vm606_vm0, %v592_v47 }
 0x12d   : > { %3348 = vmatmul.mubr.msk.bf16.gmra.mrb[104].mxu1 %vm606_vm0, %v4554_v9 }
 0x12e   : > { %3584 = vmatmul.mubr.msk.bf16.gmra.mrb[104].mxu0 %vm606_vm0, %v4420_v21  ;;  %3349 = vmatprep.mubr.msk.bf16.mxu1 %vm606_vm0, %v4575_v23 }
 0x12f   : > { %3404 = vmatpush3.bf16.xpose.msra.mxu0 %v1970_v0  ;;  %3587 = vmatprep.mubr.msk.bf16.mxu0 %vm606_vm0, %v4435_v40  ;;  %v588_v0 = vpack.c.bf16 %v499_v19, %v498_v50 }
 0x130   : > { %3746 = vmatprep.subr.msk.bf16.mxu0 %vm606_vm0, %v593_v24  ;;  %v3513_v4 = vpop.f32.mrb[0].mxu1  ;;  %v260_v24 = vld [vmem:[%s3976_s28 + $0x2b0] sm:$0xff] }
 0x131   : > { %v785_v22 = vpop.f32.mrb[0].mxu0  ;;  %2541 = vst [vmem:[%s4593_s3 + $0x40] sm:$0xff] %v3513_v4  ;;  %v1058_v39 = vpop.f32.mrb[1].mxu1  ;;  %v4677_v20 = vpack.c.bf16 %v261_v26, %v260_v24  ;;  %v268_v26 = vld [vmem:[%s3976_s28 + $0x2f0] sm:$0xff] }
 0x132   : > { %2533 = vst [vmem:[%s4593_s3] sm:$0xff] %v785_v22  ;;  %v787_v21 = vpop.f32.mrb[1].mxu0  ;;  %2535 = vst [vmem:[%s4593_s3 + $0x10] sm:$0xff] %v1058_v39  ;;  %v3514_v40 = vpop.f32.mrb[2].mxu1  ;;  %v1982_v39 = vsel %vm606_vm0, %v588_v0, 0 }
 0x133   : > { %2534 = vst [vmem:[%s4593_s3 + $0x8] sm:$0xff] %v787_v21  ;;  %v789_v28 = vpop.f32.mrb[2].mxu0  ;;  %2544 = vst [vmem:[%s4593_s3 + $0x58] sm:$0xff] %v3514_v40  ;;  %v1061_v14 = vpop.f32.mrb[3].mxu1  ;;  %v500_v40 = vld [vmem:[%s3943_s25 + $0x370] sm:$0xff] }
 0x134   : > { %2536 = vst [vmem:[%s4593_s3 + $0x18] sm:$0xff] %v789_v28  ;;  %v791_v29 = vpop.f32.mrb[3].mxu0  ;;  %2538 = vst [vmem:[%s4593_s3 + $0x28] sm:$0xff] %v1061_v14 }
 0x135   : > { %2537 = vst [vmem:[%s4593_s3 + $0x20] sm:$0xff] %v791_v29  ;;  %3350 = vmatmul.mubr.msk.bf16.gmra.mrb[108].mxu1 %vm606_vm0, %v4575_v23  ;;  %v501_v29 = vld [vmem:[%s3943_s25 + $0x378] sm:$0xff] }
 0x136   : > { %3588 = vmatmul.mubr.msk.bf16.gmra.mrb[108].mxu0 %vm606_vm0, %v4450_v58  ;;  %3351 = vmatprep.mubr.msk.bf16.mxu1 %vm606_vm0, %v4599_v57  ;;  %v513_v58 = vld [vmem:[%s3943_s25 + $0x3d8] sm:$0xff]  ;;  %v589_v14 = vpack.c.bf16 %v501_v29, %v500_v40  ;;  %v278_v29 = vld [vmem:[%s3976_s28 + $0x340] sm:$0xff] }
 0x137   : > { %3406 = vmatpush3.bf16.xpose.msra.mxu0 %v1973_v32  ;;  %3591 = vmatprep.mubr.msk.bf16.mxu0 %vm606_vm0, %v4465_v15  ;;  %v595_v60 = vpack.c.bf16 %v513_v58, %v512_v49  ;;  %v262_v32 = vld [vmem:[%s3976_s28 + $0x2c0] sm:$0xff] }
 0x138   : > { %3747 = vmatprep.subr.msk.bf16.mxu0 %vm606_vm0, %v594_v33  ;;  %v3517_v45 = vpop.f32.mrb[4].mxu1  ;;  %v263_v33 = vld [vmem:[%s3976_s28 + $0x2c8] sm:$0xff] }
 0x139   : > { %v795_v44 = vpop.f32.mrb[4].mxu0  ;;  %2553 = vst [vmem:[%s4593_s3 + $0xa0] sm:$0xff] %v3517_v45  ;;  %v1074_v54 = vpop.f32.mrb[5].mxu1  ;;  %v4703_v45 = vpack.c.bf16 %v263_v33, %v262_v32 }
 0x13a   : > { %2539 = vst [vmem:[%s4593_s3 + $0x30] sm:$0xff] %v795_v44  ;;  %v797_v51 = vpop.f32.mrb[5].mxu0  ;;  %2547 = vst [vmem:[%s4593_s3 + $0x70] sm:$0xff] %v1074_v54  ;;  %v3518_v27 = vpop.f32.mrb[6].mxu1 }
 0x13b   : > { %2540 = vst [vmem:[%s4593_s3 + $0x38] sm:$0xff] %v797_v51  ;;  %v799_v15 = vpop.f32.mrb[6].mxu0  ;;  %2556 = vst [vmem:[%s4593_s3 + $0xb8] sm:$0xff] %v3518_v27  ;;  %v1077_v37 = vpop.f32.mrb[7].mxu1  ;;  %v1985_v51 = vsel %vm606_vm0, %v589_v14, 0  ;;  %v265_v27 = vld [vmem:[%s3976_s28 + $0x2d8] sm:$0xff] }
 0x13c   : > { %2542 = vst [vmem:[%s4593_s3 + $0x48] sm:$0xff] %v799_v15  ;;  %v801_v56 = vpop.f32.mrb[7].mxu0  ;;  %2550 = vst [vmem:[%s4593_s3 + $0x88] sm:$0xff] %v1077_v37  ;;  %v264_v15 = vld [vmem:[%s3976_s28 + $0x2d0] sm:$0xff]  ;;  %v273_v37 = vld [vmem:[%s3976_s28 + $0x318] sm:$0xff] }
 0x13d   : > { %2543 = vst [vmem:[%s4593_s3 + $0x50] sm:$0xff] %v801_v56  ;;  %3352 = vmatmul.mubr.msk.bf16.gmra.mrb[112].mxu1 %vm606_vm0, %v4599_v57  ;;  %v272_v56 = vld [vmem:[%s3976_s28 + $0x310] sm:$0xff]  ;;  %v4728_v2 = vpack.c.bf16 %v265_v27, %v264_v15  ;;  %v279_v14 = vld [vmem:[%s3976_s28 + $0x348] sm:$0xff]  ;;  %v521_v27 = vld [vmem:[%s3943_s25 + $0x418] sm:$0xff] }
 0x13e   : > { %3592 = vmatmul.mubr.msk.bf16.gmra.mrb[112].mxu0 %vm606_vm0, %v4479_v36  ;;  %3353 = vmatprep.mubr.msk.bf16.mxu1 %vm606_vm0, %v4625_v55  ;;  %v515_v36 = vld [vmem:[%s3943_s25 + $0x3e8] sm:$0xff]  ;;  %v4730_v30 = vpack.c.bf16 %v273_v37, %v272_v56  ;;  %v520_v15 = vld [vmem:[%s3943_s25 + $0x410] sm:$0xff] }
 0x13f   : > { %3408 = vmatpush3.bf16.xpose.msra.mxu0 %v1976_v59  ;;  %3595 = vmatprep.mubr.msk.bf16.mxu0 %vm606_vm0, %v4496_v43  ;;  %v596_v18 = vpack.c.bf16 %v515_v36, %v514_v7  ;;  %v266_v7 = vld [vmem:[%s3976_s28 + $0x2e0] sm:$0xff]  ;;  %v267_v36 = vld [vmem:[%s3976_s28 + $0x2e8] sm:$0xff] }
 0x140   : > { %3748 = vmatprep.subr.msk.bf16.mxu0 %vm606_vm0, %v595_v60  ;;  %v3521_v6 = vpop.f32.mrb[8].mxu1  ;;  %v4752_v50 = vpack.c.bf16 %v267_v36, %v266_v7  ;;  %v522_v7 = vld [vmem:[%s3943_s25 + $0x420] sm:$0xff]  ;;  %v523_v36 = vld [vmem:[%s3943_s25 + $0x428] sm:$0xff] }
 0x141   : > { %v805_v3 = vpop.f32.mrb[8].mxu0  ;;  %2565 = vst [vmem:[%s4593_s3 + $0x100] sm:$0xff] %v3521_v6  ;;  %v1090_v11 = vpop.f32.mrb[9].mxu1 }
 0x142   : > { %2545 = vst [vmem:[%s4593_s3 + $0x60] sm:$0xff] %v805_v3  ;;  %v807_v8 = vpop.f32.mrb[9].mxu0  ;;  %2559 = vst [vmem:[%s4593_s3 + $0xd0] sm:$0xff] %v1090_v11  ;;  %v3522_v47 = vpop.f32.mrb[10].mxu1  ;;  %v275_v11 = vld [vmem:[%s3976_s28 + $0x328] sm:$0xff] }
 0x143   : > { %2546 = vst [vmem:[%s4593_s3 + $0x68] sm:$0xff] %v807_v8  ;;  %v809_v43 = vpop.f32.mrb[10].mxu0  ;;  %2568 = vst [vmem:[%s4593_s3 + $0x118] sm:$0xff] %v3522_v47  ;;  %v1093_v16 = vpop.f32.mrb[11].mxu1  ;;  %v274_v8 = vld [vmem:[%s3976_s28 + $0x320] sm:$0xff] }
 0x144   : > { %2548 = vst [vmem:[%s4593_s3 + $0x78] sm:$0xff] %v809_v43  ;;  %v811_v10 = vpop.f32.mrb[11].mxu0  ;;  %2562 = vst [vmem:[%s4593_s3 + $0xe8] sm:$0xff] %v1093_v16  ;;  %v4754_v19 = vpack.c.bf16 %v275_v11, %v274_v8 }
 0x145   : > { %2549 = vst [vmem:[%s4593_s3 + $0x80] sm:$0xff] %v811_v10  ;;  %3354 = vmatmul.mubr.msk.bf16.gmra.mrb[116].mxu1 %vm606_vm0, %v4625_v55 }
 0x146   : > { %3596 = vmatmul.mubr.msk.bf16.gmra.mrb[116].mxu0 %vm606_vm0, %v4508_v48  ;;  %3355 = vmatprep.mubr.msk.bf16.mxu1 %vm606_vm0, %v4651_v12  ;;  %v517_v48 = vld [vmem:[%s3943_s25 + $0x3f8] sm:$0xff] }
 0x147   : > { %3410 = vmatpush3.bf16.xpose.msra.mxu0 %v1979_v17  ;;  %3599 = vmatprep.mubr.msk.bf16.mxu0 %vm606_vm0, %v4520_v53  ;;  %v597_v28 = vpack.c.bf16 %v517_v48, %v516_v52  ;;  %v277_v52 = vld [vmem:[%s3976_s28 + $0x338] sm:$0xff] }
 0x148   : > { %3749 = vmatprep.subr.msk.bf16.mxu0 %vm606_vm0, %v596_v18  ;;  %v3525_v5 = vpop.f32.mrb[12].mxu1 }
 0x149   : > { %v815_v46 = vpop.f32.mrb[12].mxu0  ;;  %2577 = vst [vmem:[%s4593_s3 + $0x160] sm:$0xff] %v3525_v5  ;;  %v1106_v22 = vpop.f32.mrb[13].mxu1  ;;  %v276_v5 = vld [vmem:[%s3976_s28 + $0x330] sm:$0xff] }
 0x14a   : > { %2551 = vst [vmem:[%s4593_s3 + $0x90] sm:$0xff] %v815_v46  ;;  %v817_v1 = vpop.f32.mrb[13].mxu0  ;;  %2571 = vst [vmem:[%s4593_s3 + $0x130] sm:$0xff] %v1106_v22  ;;  %v3526_v4 = vpop.f32.mrb[14].mxu1  ;;  %v269_v46 = vld [vmem:[%s3976_s28 + $0x2f8] sm:$0xff] }
 0x14b   : > { %2552 = vst [vmem:[%s4593_s3 + $0x98] sm:$0xff] %v817_v1  ;;  %v819_v53 = vpop.f32.mrb[14].mxu0  ;;  %2580 = vst [vmem:[%s4593_s3 + $0x178] sm:$0xff] %v3526_v4  ;;  %v1109_v21 = vpop.f32.mrb[15].mxu1 }
 0x14c   : > { %2554 = vst [vmem:[%s4593_s3 + $0xa8] sm:$0xff] %v819_v53  ;;  %v821_v25 = vpop.f32.mrb[15].mxu0  ;;  %2574 = vst [vmem:[%s4593_s3 + $0x148] sm:$0xff] %v1109_v21  ;;  %v4776_v21 = vpack.c.bf16 %v269_v46, %v268_v26 }
 0x14d   : > { %2555 = vst [vmem:[%s4593_s3 + $0xb0] sm:$0xff] %v821_v25  ;;  %3356 = vmatmul.mubr.msk.bf16.gmra.mrb[120].mxu1 %vm606_vm0, %v4651_v12 }
 0x14e   : > { %3600 = vmatmul.mubr.msk.bf16.gmra.mrb[120].mxu0 %vm606_vm0, %v4536_v31  ;;  %3357 = vmatprep.mubr.msk.bf16.mxu1 %vm606_vm0, %v4677_v20  ;;  %v271_v31 = vld [vmem:[%s3976_s28 + $0x308] sm:$0xff] }
 0x14f   : > { %3412 = vmatpush3.bf16.xpose.msra.mxu0 %v1982_v39  ;;  %3603 = vmatprep.mubr.msk.bf16.mxu0 %vm606_vm0, %v4554_v9  ;;  %v4708_v54 = vpack.c.bf16 %v271_v31, %v270_v38  ;;  %v4778_v39 = vpack.c.bf16 %v277_v52, %v276_v5  ;;  %v524_v5 = vld [vmem:[%s3943_s25 + $0x430] sm:$0xff]  ;;  %v525_v52 = vld [vmem:[%s3943_s25 + $0x438] sm:$0xff] }
 0x150   : > { %3750 = vmatprep.subr.msk.bf16.mxu0 %vm606_vm0, %v597_v28  ;;  %v3529_v35 = vpop.f32.mrb[16].mxu1 }
 0x151   : > { %v825_v34 = vpop.f32.mrb[16].mxu0  ;;  %2589 = vst [vmem:[%s4593_s3 + $0x1c0] sm:$0xff] %v3529_v35  ;;  %v1122_v42 = vpop.f32.mrb[17].mxu1 }
 0x152   : > { %2557 = vst [vmem:[%s4593_s3 + $0xc0] sm:$0xff] %v825_v34  ;;  %v827_v13 = vpop.f32.mrb[17].mxu0  ;;  %2583 = vst [vmem:[%s4593_s3 + $0x190] sm:$0xff] %v1122_v42  ;;  %v3530_v44 = vpop.f32.mrb[18].mxu1 }
 0x153   : > { %2558 = vst [vmem:[%s4593_s3 + $0xc8] sm:$0xff] %v827_v13  ;;  %v829_v9 = vpop.f32.mrb[18].mxu0  ;;  %2592 = vst [vmem:[%s4593_s3 + $0x1d8] sm:$0xff] %v3530_v44  ;;  %v1125_v58 = vpop.f32.mrb[19].mxu1  ;;  %v4798_v13 = vpack.c.bf16 %v279_v14, %v278_v29  ;;  %v280_v44 = vld [vmem:[%s3976_s28 + $0x350] sm:$0xff]  ;;  %v287_v29 = vld [vmem:[%s3976_s28 + $0x388] sm:$0xff] }
 0x154   : > { %2560 = vst [vmem:[%s4593_s3 + $0xd8] sm:$0xff] %v829_v9  ;;  %v831_v49 = vpop.f32.mrb[19].mxu0  ;;  %2586 = vst [vmem:[%s4593_s3 + $0x1a8] sm:$0xff] %v1125_v58 }
 0x155   : > { %2561 = vst [vmem:[%s4593_s3 + $0xe0] sm:$0xff] %v831_v49  ;;  %3358 = vmatmul.mubr.msk.bf16.gmra.mrb[124].mxu1 %vm606_vm0, %v4677_v20  ;;  %v281_v49 = vld [vmem:[%s3976_s28 + $0x358] sm:$0xff] }
 0x156   : > { %3604 = vmatmul.mubr.msk.bf16.gmra.mrb[124].mxu0 %vm606_vm0, %v4575_v23  ;;  %3359 = vmatprep.mubr.msk.bf16.mxu1 %vm606_vm0, %v4703_v45 }
 0x157   : > { %3414 = vmatpush3.bf16.xpose.msra.mxu0 %v1985_v51  ;;  %3415 = vmatprep.mubr.msk.bf16.mxu0 %vm606_vm0, %v4708_v54 }
 0x158   : > { %v3533_v60 = vpop.f32.mrb[20].mxu1 }
 0x159   : > { %v835_v59 = vpop.f32.mrb[20].mxu0  ;;  %2601 = vst [vmem:[%s4593_s3 + $0x220] sm:$0xff] %v3533_v60  ;;  %v1138_v61 = vpop.f32.mrb[21].mxu1  ;;  %v4820_v60 = vpack.c.bf16 %v281_v49, %v280_v44 }
 0x15a   : > { %2563 = vst [vmem:[%s4593_s3 + $0xf0] sm:$0xff] %v835_v59  ;;  %v837_v23 = vpop.f32.mrb[21].mxu0  ;;  %2595 = vst [vmem:[%s4593_s3 + $0x1f0] sm:$0xff] %v1138_v61  ;;  %v3534_v63 = vpop.f32.mrb[22].mxu1 }
 0x15b   : > { %2564 = vst [vmem:[%s4593_s3 + $0xf8] sm:$0xff] %v837_v23  ;;  %v839_v62 = vpop.f32.mrb[22].mxu0  ;;  %2604 = vst [vmem:[%s4593_s3 + $0x238] sm:$0xff] %v3534_v63  ;;  %v1141_v6 = vpop.f32.mrb[23].mxu1  ;;  %v599_v63 = vpack.c.bf16 %v521_v27, %v520_v15 }
 0x15c   : > { %2566 = vst [vmem:[%s4593_s3 + $0x108] sm:$0xff] %v839_v62  ;;  %v841_v3 = vpop.f32.mrb[23].mxu0  ;;  %2598 = vst [vmem:[%s4593_s3 + $0x208] sm:$0xff] %v1141_v6  ;;  %v2012_v62 = vsel %vm606_vm0, %v4482_v41, 0  ;;  %v282_v41 = vld [vmem:[%s3976_s28 + $0x360] sm:$0xff] }
 0x15d   : > { %2567 = vst [vmem:[%s4593_s3 + $0x110] sm:$0xff] %v841_v3  ;;  %3360 = vmatmul.mubr.msk.bf16.gmra.mrb[128].mxu1 %vm606_vm0, %v4703_v45  ;;  %v283_v3 = vld [vmem:[%s3976_s28 + $0x368] sm:$0xff] }
 0x15e   : > { %3416 = vmatmul.mubr.msk.bf16.vlgmr.msra.gmra.mrb[128].mxu0 %vm606_vm0, %v4708_v54  ;;  %3361 = vmatprep.mubr.msk.bf16.mxu1 %vm606_vm0, %v4728_v2 }
 0x15f   : > { %3417 = vmatprep.mubr.msk.bf16.mxu0 %vm606_vm0, %v4730_v30 }
 0x160   : > { %v3537_v47 = vpop.f32.mrb[24].mxu1 }
 0x161   : > { %v845_v43 = vpop.f32.mrb[24].mxu0  ;;  %2613 = vst [vmem:[%s4593_s3 + $0x280] sm:$0xff] %v3537_v47  ;;  %v1154_v16 = vpop.f32.mrb[25].mxu1 }
 0x162   : > { %2569 = vst [vmem:[%s4593_s3 + $0x120] sm:$0xff] %v845_v43  ;;  %v847_v10 = vpop.f32.mrb[25].mxu0  ;;  %2607 = vst [vmem:[%s4593_s3 + $0x250] sm:$0xff] %v1154_v16  ;;  %v3538_v18 = vpop.f32.mrb[26].mxu1 }
 0x163   : > { %2570 = vst [vmem:[%s4593_s3 + $0x128] sm:$0xff] %v847_v10  ;;  %v849_v17 = vpop.f32.mrb[26].mxu0  ;;  %2616 = vst [vmem:[%s4593_s3 + $0x298] sm:$0xff] %v3538_v18  ;;  %v1157_v24 = vpop.f32.mrb[27].mxu1  ;;  %v4845_v10 = vpack.c.bf16 %v283_v3, %v282_v41  ;;  %v600_v18 = vpack.c.bf16 %v523_v36, %v522_v7  ;;  %v290_v3 = vld [vmem:[%s3976_s28 + $0x3a0] sm:$0xff] }
 0x164   : > { %2572 = vst [vmem:[%s4593_s3 + $0x138] sm:$0xff] %v849_v17  ;;  %v851_v0 = vpop.f32.mrb[27].mxu0  ;;  %2610 = vst [vmem:[%s4593_s3 + $0x268] sm:$0xff] %v1157_v24  ;;  %v2015_v17 = vsel %vm606_vm0, %v599_v63, 0  ;;  %v285_v24 = vld [vmem:[%s3976_s28 + $0x378] sm:$0xff]  ;;  %v530_v36 = vld [vmem:[%s3943_s25 + $0x460] sm:$0xff] }
 0x165   : > { %2573 = vst [vmem:[%s4593_s3 + $0x140] sm:$0xff] %v851_v0  ;;  %3362 = vmatmul.mubr.msk.bf16.gmra.mrb[132].mxu1 %vm606_vm0, %v4728_v2  ;;  %v284_v0 = vld [vmem:[%s3976_s28 + $0x370] sm:$0xff] }
 0x166   : > { %3418 = vmatmul.mubr.msk.bf16.gmra.mrb[132].mxu0 %vm606_vm0, %v4730_v30  ;;  %3363 = vmatprep.mubr.msk.bf16.mxu1 %vm606_vm0, %v4752_v50 }
 0x167   : > { %3419 = vmatprep.mubr.msk.bf16.mxu0 %vm606_vm0, %v4754_v19 }
 0x168   : > { %v3541_v1 = vpop.f32.mrb[28].mxu1 }
 0x169   : > { %v855_v48 = vpop.f32.mrb[28].mxu0  ;;  %2625 = vst [vmem:[%s4593_s3 + $0x2e0] sm:$0xff] %v3541_v1  ;;  %v1170_v53 = vpop.f32.mrb[29].mxu1 }
 0x16a   : > { %2575 = vst [vmem:[%s4593_s3 + $0x150] sm:$0xff] %v855_v48  ;;  %v857_v22 = vpop.f32.mrb[29].mxu0  ;;  %2619 = vst [vmem:[%s4593_s3 + $0x2b0] sm:$0xff] %v1170_v53  ;;  %v3542_v25 = vpop.f32.mrb[30].mxu1  ;;  %v4869_v53 = vpack.c.bf16 %v285_v24, %v284_v0 }
 0x16b   : > { %2576 = vst [vmem:[%s4593_s3 + $0x158] sm:$0xff] %v857_v22  ;;  %v859_v4 = vpop.f32.mrb[30].mxu0  ;;  %2628 = vst [vmem:[%s4593_s3 + $0x2f8] sm:$0xff] %v3542_v25  ;;  %v1173_v40 = vpop.f32.mrb[31].mxu1  ;;  %v2018_v25 = vsel %vm606_vm0, %v600_v18, 0 }
 0x16c   : > { %2578 = vst [vmem:[%s4593_s3 + $0x168] sm:$0xff] %v859_v4  ;;  %v861_v28 = vpop.f32.mrb[31].mxu0  ;;  %2622 = vst [vmem:[%s4593_s3 + $0x2c8] sm:$0xff] %v1173_v40  ;;  %v286_v40 = vld [vmem:[%s3976_s28 + $0x380] sm:$0xff] }
 0x16d   : > { %2579 = vst [vmem:[%s4593_s3 + $0x170] sm:$0xff] %v861_v28  ;;  %3364 = vmatmul.mubr.msk.bf16.gmra.mrb[136].mxu1 %vm606_vm0, %v4752_v50  ;;  %v601_v28 = vpack.c.bf16 %v525_v52, %v524_v5 }
 0x16e   : > { %3420 = vmatmul.mubr.msk.bf16.gmra.mrb[136].mxu0 %vm606_vm0, %v4754_v19  ;;  %3365 = vmatprep.mubr.msk.bf16.mxu1 %vm606_vm0, %v4776_v21 }
 0x16f   : > { %3421 = vmatprep.mubr.msk.bf16.mxu0 %vm606_vm0, %v4778_v39  ;;  %v2021_v44 = vsel %vm606_vm0, %v601_v28, 0 }
 0x170   : > { %v3545_v33 = vpop.f32.mrb[32].mxu1 }
 0x171   : > { %v865_v32 = vpop.f32.mrb[32].mxu0  ;;  %2637 = vst [vmem:[%s4593_s3 + $0x340] sm:$0xff] %v3545_v33  ;;  %v1186_v35 = vpop.f32.mrb[33].mxu1  ;;  %v526_v33 = vld [vmem:[%s3943_s25 + $0x440] sm:$0xff] }
 0x172   : > { %2581 = vst [vmem:[%s4593_s3 + $0x180] sm:$0xff] %v865_v32  ;;  %v867_v34 = vpop.f32.mrb[33].mxu0  ;;  %2631 = vst [vmem:[%s4593_s3 + $0x310] sm:$0xff] %v1186_v35  ;;  %v3546_v31 = vpop.f32.mrb[34].mxu1 }
 0x173   : > { %2582 = vst [vmem:[%s4593_s3 + $0x188] sm:$0xff] %v867_v34  ;;  %v869_v38 = vpop.f32.mrb[34].mxu0  ;;  %2640 = vst [vmem:[%s4593_s3 + $0x358] sm:$0xff] %v3546_v31  ;;  %v1189_v9 = vpop.f32.mrb[35].mxu1  ;;  %v527_v34 = vld [vmem:[%s3943_s25 + $0x448] sm:$0xff] }
 0x174   : > { %2584 = vst [vmem:[%s4593_s3 + $0x198] sm:$0xff] %v869_v38  ;;  %v871_v42 = vpop.f32.mrb[35].mxu0  ;;  %2634 = vst [vmem:[%s4593_s3 + $0x328] sm:$0xff] %v1189_v9  ;;  %v602_v49 = vpack.c.bf16 %v527_v34, %v526_v33  ;;  %v295_v33 = vld [vmem:[%s3976_s28 + $0x3c8] sm:$0xff] }
 0x175   : > { %2585 = vst [vmem:[%s4593_s3 + $0x1a0] sm:$0xff] %v871_v42  ;;  %3366 = vmatmul.mubr.msk.bf16.gmra.mrb[140].mxu1 %vm606_vm0, %v4776_v21  ;;  %v4893_v42 = vpack.c.bf16 %v287_v29, %v286_v40 }
 0x176   : > { %3422 = vmatmul.mubr.msk.bf16.gmra.mrb[140].mxu0 %vm606_vm0, %v4778_v39  ;;  %3607 = vmatprep.mubr.msk.bf16.mxu1 %vm606_vm0, %v4599_v57 }
 0x177   : > { %3423 = vmatprep.mubr.msk.bf16.mxu0 %vm606_vm0, %v4798_v13 }
 0x178   : > { %v3549_v51 = vpop.f32.mrb[36].mxu1 }
 0x179   : > { %v875_v58 = vpop.f32.mrb[36].mxu0  ;;  %2649 = vst [vmem:[%s4593_s3 + $0x3a0] sm:$0xff] %v3549_v51  ;;  %v1202_v37 = vpop.f32.mrb[37].mxu1  ;;  %v289_v51 = vld [vmem:[%s3976_s28 + $0x398] sm:$0xff] }
 0x17a   : > { %2587 = vst [vmem:[%s4593_s3 + $0x1b0] sm:$0xff] %v875_v58  ;;  %v877_v56 = vpop.f32.mrb[37].mxu0  ;;  %2643 = vst [vmem:[%s4593_s3 + $0x370] sm:$0xff] %v1202_v37  ;;  %v3550_v59 = vpop.f32.mrb[38].mxu1  ;;  %v288_v58 = vld [vmem:[%s3976_s28 + $0x390] sm:$0xff]  ;;  %v529_v37 = vld [vmem:[%s3943_s25 + $0x458] sm:$0xff] }
 0x17b   : > { %2588 = vst [vmem:[%s4593_s3 + $0x1b8] sm:$0xff] %v877_v56  ;;  %v879_v57 = vpop.f32.mrb[38].mxu0  ;;  %2652 = vst [vmem:[%s4593_s3 + $0x3b8] sm:$0xff] %v3550_v59  ;;  %v1205_v61 = vpop.f32.mrb[39].mxu1  ;;  %v528_v56 = vld [vmem:[%s3943_s25 + $0x450] sm:$0xff] }
 0x17c   : > { %2590 = vst [vmem:[%s4593_s3 + $0x1c8] sm:$0xff] %v879_v57  ;;  %v881_v23 = vpop.f32.mrb[39].mxu0  ;;  %2646 = vst [vmem:[%s4593_s3 + $0x388] sm:$0xff] %v1205_v61  ;;  %v4917_v61 = vpack.c.bf16 %v289_v51, %v288_v58  ;;  %v603_v41 = vpack.c.bf16 %v529_v37, %v528_v56  ;;  %v296_v51 = vld [vmem:[%s3976_s28 + $0x3d0] sm:$0xff] }
 0x17d   : > { %2591 = vst [vmem:[%s4593_s3 + $0x1d0] sm:$0xff] %v881_v23  ;;  %3608 = vmatmul.mubr.msk.bf16.vlgmr.msra.gmra.mrb[144].mxu1 %vm606_vm0, %v4625_v55 }
 0x17e   : > { %3424 = vmatmul.mubr.msk.bf16.gmra.mrb[144].mxu0 %vm606_vm0, %v4798_v13  ;;  %3624 = vmatpush3.bf16.xpose.msra.mxu1 %v2012_v62  ;;  %v2027_v0 = vsel %vm606_vm0, %v603_v41, 0 }
 0x17f   : > { %3425 = vmatprep.mubr.msk.bf16.mxu0 %vm606_vm0, %v4820_v60  ;;  %3752 = vmatprep.subr.msk.bf16.mxu1 %vm606_vm0, %v599_v63  ;;  %v2024_v63 = vsel %vm606_vm0, %v602_v49, 0 }
 0x180   : > { %3611 = vmatprep.mubr.msk.bf16.mxu1 %vm606_vm0, %v4651_v12  ;;  %v3553_v55 = vpop.f32.mrb[40].mxu1 }
 0x181   : > { %v885_v6 = vpop.f32.mrb[40].mxu0  ;;  %2661 = vst [vmem:[%s4593_s3 + $0x400] sm:$0xff] %v3553_v55  ;;  %v1218_v11 = vpop.f32.mrb[41].mxu1 }
 0x182   : > { %2593 = vst [vmem:[%s4593_s3 + $0x1e0] sm:$0xff] %v885_v6  ;;  %v887_v8 = vpop.f32.mrb[41].mxu0  ;;  %2655 = vst [vmem:[%s4593_s3 + $0x3d0] sm:$0xff] %v1218_v11  ;;  %v3554_v47 = vpop.f32.mrb[42].mxu1  ;;  %v291_v6 = vld [vmem:[%s3976_s28 + $0x3a8] sm:$0xff] }
 0x183   : > { %2594 = vst [vmem:[%s4593_s3 + $0x1e8] sm:$0xff] %v887_v8  ;;  %v889_v43 = vpop.f32.mrb[42].mxu0  ;;  %2664 = vst [vmem:[%s4593_s3 + $0x418] sm:$0xff] %v3554_v47  ;;  %v1221_v16 = vpop.f32.mrb[43].mxu1  ;;  %v531_v8 = vld [vmem:[%s3943_s25 + $0x468] sm:$0xff] }
 0x184   : > { %2596 = vst [vmem:[%s4593_s3 + $0x1f8] sm:$0xff] %v889_v43  ;;  %v891_v12 = vpop.f32.mrb[43].mxu0  ;;  %2658 = vst [vmem:[%s4593_s3 + $0x3e8] sm:$0xff] %v1221_v16  ;;  %v4937_v16 = vpack.c.bf16 %v291_v6, %v290_v3  ;;  %v604_v24 = vpack.c.bf16 %v531_v8, %v530_v36 }
 0x185   : > { %2597 = vst [vmem:[%s4593_s3 + $0x200] sm:$0xff] %v891_v12  ;;  %3612 = vmatmul.mubr.msk.bf16.gmra.mrb[148].mxu1 %vm606_vm0, %v4677_v20 }
 0x186   : > { %3426 = vmatmul.mubr.msk.bf16.gmra.mrb[148].mxu0 %vm606_vm0, %v4820_v60  ;;  %3626 = vmatpush3.bf16.xpose.msra.mxu1 %v2015_v17  ;;  %v2030_v29 = vsel %vm606_vm0, %v604_v24, 0 }
 0x187   : > { %3427 = vmatprep.mubr.msk.bf16.mxu0 %vm606_vm0, %v4845_v10  ;;  %3753 = vmatprep.subr.msk.bf16.mxu1 %vm606_vm0, %v600_v18 }
 0x188   : > { %3615 = vmatprep.mubr.msk.bf16.mxu1 %vm606_vm0, %v4703_v45  ;;  %v3557_v46 = vpop.f32.mrb[44].mxu1 }
 0x189   : > { %v895_v26 = vpop.f32.mrb[44].mxu0  ;;  %2673 = vst [vmem:[%s4593_s3 + $0x460] sm:$0xff] %v3557_v46  ;;  %v1234_v48 = vpop.f32.mrb[45].mxu1  ;;  %v293_v46 = vld [vmem:[%s3976_s28 + $0x3b8] sm:$0xff] }
 0x18a   : > { %2599 = vst [vmem:[%s4593_s3 + $0x210] sm:$0xff] %v895_v26  ;;  %v897_v20 = vpop.f32.mrb[45].mxu0  ;;  %2667 = vst [vmem:[%s4593_s3 + $0x430] sm:$0xff] %v1234_v48  ;;  %v3558_v22 = vpop.f32.mrb[46].mxu1  ;;  %v292_v26 = vld [vmem:[%s3976_s28 + $0x3b0] sm:$0xff]  ;;  %v533_v48 = vld [vmem:[%s3943_s25 + $0x478] sm:$0xff] }
 0x18b   : > { %2600 = vst [vmem:[%s4593_s3 + $0x218] sm:$0xff] %v897_v20  ;;  %v899_v1 = vpop.f32.mrb[46].mxu0  ;;  %2676 = vst [vmem:[%s4593_s3 + $0x478] sm:$0xff] %v3558_v22  ;;  %v1237_v4 = vpop.f32.mrb[47].mxu1  ;;  %v532_v20 = vld [vmem:[%s3943_s25 + $0x470] sm:$0xff] }
 0x18c   : > { %2602 = vst [vmem:[%s4593_s3 + $0x228] sm:$0xff] %v899_v1  ;;  %v901_v45 = vpop.f32.mrb[47].mxu0  ;;  %2670 = vst [vmem:[%s4593_s3 + $0x448] sm:$0xff] %v1237_v4 }
 0x18d   : > { %2603 = vst [vmem:[%s4593_s3 + $0x230] sm:$0xff] %v901_v45  ;;  %3616 = vmatmul.mubr.msk.bf16.gmra.mrb[152].mxu1 %vm606_vm0, %v4728_v2 }
 0x18e   : > { %3428 = vmatmul.mubr.msk.bf16.gmra.mrb[152].mxu0 %vm606_vm0, %v4845_v10  ;;  %3628 = vmatpush3.bf16.xpose.msra.mxu1 %v2018_v25  ;;  %v4957_v25 = vpack.c.bf16 %v293_v46, %v292_v26 }
 0x18f   : > { %3429 = vmatprep.mubr.msk.bf16.mxu0 %vm606_vm0, %v4869_v53  ;;  %3754 = vmatprep.subr.msk.bf16.mxu1 %vm606_vm0, %v601_v28 }
 0x190   : > { %3619 = vmatprep.mubr.msk.bf16.mxu1 %vm606_vm0, %v4752_v50  ;;  %v1427_v32 = vpop.f32.mrb[48].mxu1 }
 0x191   : > { %v905_v14 = vpop.f32.mrb[48].mxu0  ;;  %2677 = vst [vmem:[%s4593_s3 + $0x480] sm:$0xff] %v1427_v32  ;;  %v1429_v35 = vpop.f32.mrb[49].mxu1  ;;  %v294_v32 = vld [vmem:[%s3976_s28 + $0x3c0] sm:$0xff] }
 0x192   : > { %2605 = vst [vmem:[%s4593_s3 + $0x240] sm:$0xff] %v905_v14  ;;  %v907_v2 = vpop.f32.mrb[49].mxu0  ;;  %2678 = vst [vmem:[%s4593_s3 + $0x488] sm:$0xff] %v1429_v35  ;;  %v1431_v31 = vpop.f32.mrb[50].mxu1  ;;  %v605_v14 = vpack.c.bf16 %v533_v48, %v532_v20 }
 0x193   : > { %2606 = vst [vmem:[%s4593_s3 + $0x248] sm:$0xff] %v907_v2  ;;  %v909_v38 = vpop.f32.mrb[50].mxu0  ;;  %2680 = vst [vmem:[%s4593_s3 + $0x498] sm:$0xff] %v1431_v31  ;;  %v1433_v9 = vpop.f32.mrb[51].mxu1 }
 0x194   : > { %2608 = vst [vmem:[%s4593_s3 + $0x258] sm:$0xff] %v909_v38  ;;  %v911_v50 = vpop.f32.mrb[51].mxu0  ;;  %2681 = vst [vmem:[%s4593_s3 + $0x4a0] sm:$0xff] %v1433_v9  ;;  %v4975_v9 = vpack.c.bf16 %v295_v33, %v294_v32  ;;  %v2033_v58 = vsel %vm606_vm0, %v605_v14, 0 }
 0x195   : > { %2609 = vst [vmem:[%s4593_s3 + $0x260] sm:$0xff] %v911_v50  ;;  %3620 = vmatmul.mubr.msk.bf16.gmra.mrb[156].mxu1 %vm606_vm0, %v4776_v21 }
 0x196   : > { %3430 = vmatmul.mubr.msk.bf16.gmra.mrb[156].mxu0 %vm606_vm0, %v4869_v53  ;;  %3630 = vmatpush3.bf16.xpose.msra.mxu1 %v2021_v44 }
 0x197   : > { %3431 = vmatprep.mubr.msk.bf16.mxu0 %vm606_vm0, %v4893_v42  ;;  %3755 = vmatprep.subr.msk.bf16.mxu1 %vm606_vm0, %v602_v49 }
 0x198   : > { %3639 = vmatprep.mubr.msk.bf16.mxu1 %vm606_vm0, %v4708_v54  ;;  %v1437_v27 = vpop.f32.mrb[52].mxu1 }
 0x199   : > { %v915_v15 = vpop.f32.mrb[52].mxu0  ;;  %2683 = vst [vmem:[%s4593_s3 + $0x4b0] sm:$0xff] %v1437_v27  ;;  %v1439_v57 = vpop.f32.mrb[53].mxu1 }
 0x19a   : > { %2611 = vst [vmem:[%s4593_s3 + $0x270] sm:$0xff] %v915_v15  ;;  %v917_v21 = vpop.f32.mrb[53].mxu0  ;;  %2684 = vst [vmem:[%s4593_s3 + $0x4b8] sm:$0xff] %v1439_v57  ;;  %v1441_v23 = vpop.f32.mrb[54].mxu1  ;;  %v297_v15 = vld [vmem:[%s3976_s28 + $0x3d8] sm:$0xff] }
 0x19b   : > { %2612 = vst [vmem:[%s4593_s3 + $0x278] sm:$0xff] %v917_v21  ;;  %v919_v59 = vpop.f32.mrb[54].mxu0  ;;  %2686 = vst [vmem:[%s4593_s3 + $0x4c8] sm:$0xff] %v1441_v23  ;;  %v1443_v62 = vpop.f32.mrb[55].mxu1  ;;  %v4992_v23 = vpack.c.bf16 %v297_v15, %v296_v51 }
 0x19c   : > { %2614 = vst [vmem:[%s4593_s3 + $0x288] sm:$0xff] %v919_v59  ;;  %v921_v54 = vpop.f32.mrb[55].mxu0  ;;  %2687 = vst [vmem:[%s4593_s3 + $0x4d0] sm:$0xff] %v1443_v62 }
 0x19d   : > { %2615 = vst [vmem:[%s4593_s3 + $0x290] sm:$0xff] %v921_v54 }
 0x19e   : > { %3432 = vmatmul.mubr.msk.bf16.gmra.mrb[160].mxu0 %vm606_vm0, %v4893_v42  ;;  %3632 = vmatpush3.bf16.xpose.msra.mxu1 %v2024_v63  ;;  %v298_v63 = vld [vmem:[%s3976_s28 + $0x3e0] sm:$0xff] }
 0x19f   : > { %3433 = vmatprep.mubr.msk.bf16.mxu0 %vm606_vm0, %v4917_v61  ;;  %3756 = vmatprep.subr.msk.bf16.mxu1 %vm606_vm0, %v603_v41  ;;  %v299_v41 = vld [vmem:[%s3976_s28 + $0x3e8] sm:$0xff] }
 0x1a0   : > { %v1447_v7 = vpop.f32.mrb[56].mxu1  ;;  %v5012_v36 = vpack.c.bf16 %v299_v41, %v298_v63 }
 0x1a1   : > { %v925_v55 = vpop.f32.mrb[56].mxu0  ;;  %2689 = vst [vmem:[%s4593_s3 + $0x4e0] sm:$0xff] %v1447_v7  ;;  %v1449_v43 = vpop.f32.mrb[57].mxu1 }
 0x1a2   : > { %2617 = vst [vmem:[%s4593_s3 + $0x2a0] sm:$0xff] %v925_v55  ;;  %v927_v11 = vpop.f32.mrb[57].mxu0  ;;  %2690 = vst [vmem:[%s4593_s3 + $0x4e8] sm:$0xff] %v1449_v43  ;;  %v1451_v12 = vpop.f32.mrb[58].mxu1  ;;  %v300_v43 = vld [vmem:[%s3976_s28 + $0x3f0] sm:$0xff] }
 0x1a3   : > { %2618 = vst [vmem:[%s4593_s3 + $0x2a8] sm:$0xff] %v927_v11  ;;  %v929_v47 = vpop.f32.mrb[58].mxu0  ;;  %2692 = vst [vmem:[%s4593_s3 + $0x4f8] sm:$0xff] %v1451_v12  ;;  %v1453_v18 = vpop.f32.mrb[59].mxu1 }
 0x1a4   : > { %2620 = vst [vmem:[%s4593_s3 + $0x2b8] sm:$0xff] %v929_v47  ;;  %v931_v17 = vpop.f32.mrb[59].mxu0  ;;  %2693 = vst [vmem:[%s4593_s3 + $0x500] sm:$0xff] %v1453_v18  ;;  %v301_v47 = vld [vmem:[%s3976_s28 + $0x3f8] sm:$0xff] }
 0x1a5   : > { %2621 = vst [vmem:[%s4593_s3 + $0x2c0] sm:$0xff] %v931_v17 }
 0x1a6   : > { %3434 = vmatmul.mubr.msk.bf16.gmra.mrb[164].mxu0 %vm606_vm0, %v4917_v61  ;;  %3634 = vmatpush3.bf16.xpose.msra.mxu1 %v2027_v0 }
 0x1a7   : > { %3435 = vmatprep.mubr.msk.bf16.mxu0 %vm606_vm0, %v4937_v16  ;;  %3757 = vmatprep.subr.msk.bf16.mxu1 %vm606_vm0, %v604_v24  ;;  %v5032_v24 = vpack.c.bf16 %v301_v47, %v300_v43 }
 0x1a8   : > { %v1457_v52 = vpop.f32.mrb[60].mxu1 }
 0x1a9   : > { %v935_v5 = vpop.f32.mrb[60].mxu0  ;;  %2695 = vst [vmem:[%s4593_s3 + $0x510] sm:$0xff] %v1457_v52  ;;  %v1459_v22 = vpop.f32.mrb[61].mxu1  ;;  %v303_v52 = vld [vmem:[%s3976_s28 + $0x408] sm:$0xff] }
 0x1aa   : > { %2623 = vst [vmem:[%s4593_s3 + $0x2d0] sm:$0xff] %v935_v5  ;;  %v937_v1 = vpop.f32.mrb[61].mxu0  ;;  %2696 = vst [vmem:[%s4593_s3 + $0x518] sm:$0xff] %v1459_v22  ;;  %v1461_v4 = vpop.f32.mrb[62].mxu1  ;;  %v302_v5 = vld [vmem:[%s3976_s28 + $0x400] sm:$0xff] }
 0x1ab   : > { %2624 = vst [vmem:[%s4593_s3 + $0x2d8] sm:$0xff] %v937_v1  ;;  %v939_v45 = vpop.f32.mrb[62].mxu0  ;;  %2698 = vst [vmem:[%s4593_s3 + $0x528] sm:$0xff] %v1461_v4  ;;  %v1463_v40 = vpop.f32.mrb[63].mxu1 }
 0x1ac   : > { %2626 = vst [vmem:[%s4593_s3 + $0x2e8] sm:$0xff] %v939_v45  ;;  %v941_v28 = vpop.f32.mrb[63].mxu0  ;;  %2699 = vst [vmem:[%s4593_s3 + $0x530] sm:$0xff] %v1463_v40  ;;  %v5052_v45 = vpack.c.bf16 %v303_v52, %v302_v5  ;;  %v304_v40 = vld [vmem:[%s3976_s28 + $0x410] sm:$0xff] }
 0x1ad   : > { %2627 = vst [vmem:[%s4593_s3 + $0x2f0] sm:$0xff] %v941_v28 }
 0x1ae   : > { %3436 = vmatmul.mubr.msk.bf16.gmra.mrb[168].mxu0 %vm606_vm0, %v4937_v16  ;;  %3636 = vmatpush3.bf16.xpose.msra.mxu1 %v2030_v29  ;;  %v305_v29 = vld [vmem:[%s3976_s28 + $0x418] sm:$0xff] }
 0x1af   : > { %3437 = vmatprep.mubr.msk.bf16.mxu0 %vm606_vm0, %v4957_v25  ;;  %3758 = vmatprep.subr.msk.bf16.mxu1 %vm606_vm0, %v605_v14 }
 0x1b0   : > { %v1467_v2 = vpop.f32.mrb[64].mxu1 }
 0x1b1   : > { %v945_v34 = vpop.f32.mrb[64].mxu0  ;;  %2701 = vst [vmem:[%s4593_s3 + $0x540] sm:$0xff] %v1467_v2  ;;  %v1469_v38 = vpop.f32.mrb[65].mxu1  ;;  %v5072_v2 = vpack.c.bf16 %v305_v29, %v304_v40 }
 0x1b2   : > { %2629 = vst [vmem:[%s4593_s3 + $0x300] sm:$0xff] %v945_v34  ;;  %v947_v35 = vpop.f32.mrb[65].mxu0  ;;  %2702 = vst [vmem:[%s4593_s3 + $0x548] sm:$0xff] %v1469_v38  ;;  %v1471_v50 = vpop.f32.mrb[66].mxu1 }
 0x1b3   : > { %2630 = vst [vmem:[%s4593_s3 + $0x308] sm:$0xff] %v947_v35  ;;  %v949_v31 = vpop.f32.mrb[66].mxu0  ;;  %2704 = vst [vmem:[%s4593_s3 + $0x558] sm:$0xff] %v1471_v50  ;;  %v1473_v49 = vpop.f32.mrb[67].mxu1  ;;  %v307_v50 = vld [vmem:[%s3976_s28 + $0x428] sm:$0xff] }
 0x1b4   : > { %2632 = vst [vmem:[%s4593_s3 + $0x318] sm:$0xff] %v949_v31  ;;  %v951_v44 = vpop.f32.mrb[67].mxu0  ;;  %2705 = vst [vmem:[%s4593_s3 + $0x560] sm:$0xff] %v1473_v49  ;;  %v306_v31 = vld [vmem:[%s3976_s28 + $0x420] sm:$0xff] }
 0x1b5   : > { %2633 = vst [vmem:[%s4593_s3 + $0x320] sm:$0xff] %v951_v44  ;;  %v5092_v15 = vpack.c.bf16 %v307_v50, %v306_v31 }
 0x1b6   : > { %3438 = vmatmul.mubr.msk.bf16.gmra.mrb[172].mxu0 %vm606_vm0, %v4957_v25  ;;  %3638 = vmatpush3.bf16.xpose.msra.mxu1 %v2033_v58 }
 0x1b7   : > { %3439 = vmatprep.mubr.msk.bf16.mxu0 %vm606_vm0, %v4975_v9 }
 0x1b8   : > { %v1477_v56 = vpop.f32.mrb[68].mxu1 }
 0x1b9   : > { %v955_v27 = vpop.f32.mrb[68].mxu0  ;;  %2707 = vst [vmem:[%s4593_s3 + $0x570] sm:$0xff] %v1477_v56  ;;  %v1479_v21 = vpop.f32.mrb[69].mxu1 }
 0x1ba   : > { %2635 = vst [vmem:[%s4593_s3 + $0x330] sm:$0xff] %v955_v27  ;;  %v957_v37 = vpop.f32.mrb[69].mxu0  ;;  %2708 = vst [vmem:[%s4593_s3 + $0x578] sm:$0xff] %v1479_v21  ;;  %v1481_v59 = vpop.f32.mrb[70].mxu1  ;;  %v309_v21 = vld [vmem:[%s3976_s28 + $0x438] sm:$0xff] }
 0x1bb   : > { %2636 = vst [vmem:[%s4593_s3 + $0x338] sm:$0xff] %v957_v37  ;;  %v959_v57 = vpop.f32.mrb[70].mxu0  ;;  %2710 = vst [vmem:[%s4593_s3 + $0x588] sm:$0xff] %v1481_v59  ;;  %v1483_v62 = vpop.f32.mrb[71].mxu1  ;;  %v308_v37 = vld [vmem:[%s3976_s28 + $0x430] sm:$0xff] }
 0x1bc   : > { %2638 = vst [vmem:[%s4593_s3 + $0x348] sm:$0xff] %v959_v57  ;;  %v961_v54 = vpop.f32.mrb[71].mxu0  ;;  %2711 = vst [vmem:[%s4593_s3 + $0x590] sm:$0xff] %v1483_v62  ;;  %v5112_v63 = vpack.c.bf16 %v309_v21, %v308_v37 }
 0x1bd   : > { %2639 = vst [vmem:[%s4593_s3 + $0x350] sm:$0xff] %v961_v54  ;;  %3640 = vmatmul.mubr.msk.bf16.vlgmr.msra.gmra.mrb[160].mxu1 %vm606_vm0, %v4730_v30 }
 0x1be   : > { %3440 = vmatmul.mubr.msk.bf16.gmra.mrb[176].mxu0 %vm606_vm0, %v4975_v9  ;;  %3643 = vmatprep.mubr.msk.bf16.mxu1 %vm606_vm0, %v4754_v19 }
 0x1bf   : > { %3441 = vmatprep.mubr.msk.bf16.mxu0 %vm606_vm0, %v4992_v23 }
 0x1c0   : > { %v1487_v6 = vpop.f32.mrb[72].mxu1 }
 0x1c1   : > { %v965_v3 = vpop.f32.mrb[72].mxu0  ;;  %2713 = vst [vmem:[%s4593_s3 + $0x5a0] sm:$0xff] %v1487_v6  ;;  %v1489_v55 = vpop.f32.mrb[73].mxu1  ;;  %v310_v6 = vld [vmem:[%s3976_s28 + $0x440] sm:$0xff] }
 0x1c2   : > { %2641 = vst [vmem:[%s4593_s3 + $0x360] sm:$0xff] %v965_v3  ;;  %v967_v30 = vpop.f32.mrb[73].mxu0  ;;  %2714 = vst [vmem:[%s4593_s3 + $0x5a8] sm:$0xff] %v1489_v55  ;;  %v1491_v19 = vpop.f32.mrb[74].mxu1 }
 0x1c3   : > { %2642 = vst [vmem:[%s4593_s3 + $0x368] sm:$0xff] %v967_v30  ;;  %v969_v7 = vpop.f32.mrb[74].mxu0  ;;  %2716 = vst [vmem:[%s4593_s3 + $0x5b8] sm:$0xff] %v1491_v19  ;;  %v1493_v11 = vpop.f32.mrb[75].mxu1  ;;  %v311_v30 = vld [vmem:[%s3976_s28 + $0x448] sm:$0xff] }
 0x1c4   : > { %2644 = vst [vmem:[%s4593_s3 + $0x378] sm:$0xff] %v969_v7  ;;  %v971_v8 = vpop.f32.mrb[75].mxu0  ;;  %2717 = vst [vmem:[%s4593_s3 + $0x5c0] sm:$0xff] %v1493_v11  ;;  %v386_v11 = vpack.c.bf16 %v311_v30, %v310_v6 }
 0x1c5   : > { %2645 = vst [vmem:[%s4593_s3 + $0x380] sm:$0xff] %v971_v8  ;;  %3644 = vmatmul.mubr.msk.bf16.gmra.mrb[164].mxu1 %vm606_vm0, %v4778_v39 }
 0x1c6   : > { %3442 = vmatmul.mubr.msk.bf16.gmra.mrb[180].mxu0 %vm606_vm0, %v4992_v23  ;;  %3647 = vmatprep.mubr.msk.bf16.mxu1 %vm606_vm0, %v4798_v13 }
 0x1c7   : > { %3443 = vmatprep.mubr.msk.bf16.mxu0 %vm606_vm0, %v5012_v36 }
 0x1c8   : > { %v1497_v17 = vpop.f32.mrb[76].mxu1 }
 0x1c9   : > { %v975_v12 = vpop.f32.mrb[76].mxu0  ;;  %2719 = vst [vmem:[%s4593_s3 + $0x5d0] sm:$0xff] %v1497_v17  ;;  %v1499_v18 = vpop.f32.mrb[77].mxu1  ;;  %v313_v17 = vld [vmem:[%s3976_s28 + $0x458] sm:$0xff] }
 0x1ca   : > { %2647 = vst [vmem:[%s4593_s3 + $0x390] sm:$0xff] %v975_v12  ;;  %v977_v39 = vpop.f32.mrb[77].mxu0  ;;  %2720 = vst [vmem:[%s4593_s3 + $0x5d8] sm:$0xff] %v1499_v18  ;;  %v1501_v13 = vpop.f32.mrb[78].mxu1  ;;  %v312_v12 = vld [vmem:[%s3976_s28 + $0x450] sm:$0xff] }
 0x1cb   : > { %2648 = vst [vmem:[%s4593_s3 + $0x398] sm:$0xff] %v977_v39  ;;  %v979_v0 = vpop.f32.mrb[78].mxu0  ;;  %2722 = vst [vmem:[%s4593_s3 + $0x5e8] sm:$0xff] %v1501_v13  ;;  %v1503_v46 = vpop.f32.mrb[79].mxu1 }
 0x1cc   : > { %2650 = vst [vmem:[%s4593_s3 + $0x3a8] sm:$0xff] %v979_v0  ;;  %v981_v26 = vpop.f32.mrb[79].mxu0  ;;  %2723 = vst [vmem:[%s4593_s3 + $0x5f0] sm:$0xff] %v1503_v46  ;;  %v387_v46 = vpack.c.bf16 %v313_v17, %v312_v12 }
 0x1cd   : > { %2651 = vst [vmem:[%s4593_s3 + $0x3b0] sm:$0xff] %v981_v26  ;;  %3648 = vmatmul.mubr.msk.bf16.gmra.mrb[168].mxu1 %vm606_vm0, %v4820_v60 }
 0x1ce   : > { %3444 = vmatmul.mubr.msk.bf16.gmra.mrb[184].mxu0 %vm606_vm0, %v5012_v36  ;;  %3651 = vmatprep.mubr.msk.bf16.mxu1 %vm606_vm0, %v4845_v10 }
 0x1cf   : > { %3445 = vmatprep.mubr.msk.bf16.mxu0 %vm606_vm0, %v5032_v24 }
 0x1d0   : > { %v1507_v48 = vpop.f32.mrb[80].mxu1 }
 0x1d1   : > { %v985_v20 = vpop.f32.mrb[80].mxu0  ;;  %2725 = vst [vmem:[%s4593_s3 + $0x600] sm:$0xff] %v1507_v48  ;;  %v1509_v1 = vpop.f32.mrb[81].mxu1  ;;  %v315_v48 = vld [vmem:[%s3976_s28 + $0x468] sm:$0xff] }
 0x1d2   : > { %2653 = vst [vmem:[%s4593_s3 + $0x3c0] sm:$0xff] %v985_v20  ;;  %v987_v60 = vpop.f32.mrb[81].mxu0  ;;  %2726 = vst [vmem:[%s4593_s3 + $0x608] sm:$0xff] %v1509_v1  ;;  %v1511_v10 = vpop.f32.mrb[82].mxu1  ;;  %v314_v20 = vld [vmem:[%s3976_s28 + $0x460] sm:$0xff] }
 0x1d3   : > { %2654 = vst [vmem:[%s4593_s3 + $0x3c8] sm:$0xff] %v987_v60  ;;  %v989_v22 = vpop.f32.mrb[82].mxu0  ;;  %2728 = vst [vmem:[%s4593_s3 + $0x618] sm:$0xff] %v1511_v10  ;;  %v1513_v28 = vpop.f32.mrb[83].mxu1 }
 0x1d4   : > { %2656 = vst [vmem:[%s4593_s3 + $0x3d8] sm:$0xff] %v989_v22  ;;  %v991_v4 = vpop.f32.mrb[83].mxu0  ;;  %2729 = vst [vmem:[%s4593_s3 + $0x620] sm:$0xff] %v1513_v28  ;;  %v388_v28 = vpack.c.bf16 %v315_v48, %v314_v20 }
 0x1d5   : > { %2657 = vst [vmem:[%s4593_s3 + $0x3e0] sm:$0xff] %v991_v4  ;;  %3652 = vmatmul.mubr.msk.bf16.gmra.mrb[172].mxu1 %vm606_vm0, %v4869_v53 }
 0x1d6   : > { %3446 = vmatmul.mubr.msk.bf16.gmra.mrb[188].mxu0 %vm606_vm0, %v5032_v24  ;;  %3655 = vmatprep.mubr.msk.bf16.mxu1 %vm606_vm0, %v4893_v42 }
 0x1d7   : > { %3447 = vmatprep.mubr.msk.bf16.mxu0 %vm606_vm0, %v5052_v45 }
 0x1d8   : > { %v1517_v32 = vpop.f32.mrb[84].mxu1 }
 0x1d9   : > { %v995_v14 = vpop.f32.mrb[84].mxu0  ;;  %2731 = vst [vmem:[%s4593_s3 + $0x630] sm:$0xff] %v1517_v32  ;;  %v1519_v33 = vpop.f32.mrb[85].mxu1  ;;  %v317_v32 = vld [vmem:[%s3976_s28 + $0x478] sm:$0xff] }
 0x1da   : > { %2659 = vst [vmem:[%s4593_s3 + $0x3f0] sm:$0xff] %v995_v14  ;;  %v997_v53 = vpop.f32.mrb[85].mxu0  ;;  %2732 = vst [vmem:[%s4593_s3 + $0x638] sm:$0xff] %v1519_v33  ;;  %v1521_v42 = vpop.f32.mrb[86].mxu1  ;;  %v316_v14 = vld [vmem:[%s3976_s28 + $0x470] sm:$0xff] }
 0x1db   : > { %2660 = vst [vmem:[%s4593_s3 + $0x3f8] sm:$0xff] %v997_v53  ;;  %v999_v34 = vpop.f32.mrb[86].mxu0  ;;  %2734 = vst [vmem:[%s4593_s3 + $0x648] sm:$0xff] %v1521_v42  ;;  %v1523_v38 = vpop.f32.mrb[87].mxu1 }
 0x1dc   : > { %2662 = vst [vmem:[%s4593_s3 + $0x408] sm:$0xff] %v999_v34  ;;  %v1001_v35 = vpop.f32.mrb[87].mxu0  ;;  %2735 = vst [vmem:[%s4593_s3 + $0x650] sm:$0xff] %v1523_v38  ;;  %v389_v38 = vpack.c.bf16 %v317_v32, %v316_v14 }
 0x1dd   : > { %2663 = vst [vmem:[%s4593_s3 + $0x410] sm:$0xff] %v1001_v35  ;;  %3656 = vmatmul.mubr.msk.bf16.gmra.mrb[176].mxu1 %vm606_vm0, %v4917_v61 }
 0x1de   : > { %3448 = vmatmul.mubr.msk.bf16.gmra.mrb[192].mxu0 %vm606_vm0, %v5052_v45  ;;  %3659 = vmatprep.mubr.msk.bf16.mxu1 %vm606_vm0, %v4937_v16 }
 0x1df   : > { %3449 = vmatprep.mubr.msk.bf16.mxu0 %vm606_vm0, %v5072_v2 }
 0x1e0   : > { %v1527_v49 = vpop.f32.mrb[88].mxu1 }
 0x1e1   : > { %v1005_v44 = vpop.f32.mrb[88].mxu0  ;;  %2737 = vst [vmem:[%s4593_s3 + $0x660] sm:$0xff] %v1527_v49  ;;  %v1529_v58 = vpop.f32.mrb[89].mxu1 }
 0x1e2   : > { %2665 = vst [vmem:[%s4593_s3 + $0x420] sm:$0xff] %v1005_v44  ;;  %v1007_v61 = vpop.f32.mrb[89].mxu0  ;;  %2738 = vst [vmem:[%s4593_s3 + $0x668] sm:$0xff] %v1529_v58  ;;  %v1531_v16 = vpop.f32.mrb[90].mxu1 }
 0x1e3   : > { %2666 = vst [vmem:[%s4593_s3 + $0x428] sm:$0xff] %v1007_v61  ;;  %v1009_v51 = vpop.f32.mrb[90].mxu0  ;;  %2740 = vst [vmem:[%s4593_s3 + $0x678] sm:$0xff] %v1531_v16  ;;  %v1533_v56 = vpop.f32.mrb[91].mxu1 }
 0x1e4   : > { %2668 = vst [vmem:[%s4593_s3 + $0x438] sm:$0xff] %v1009_v51  ;;  %v1011_v27 = vpop.f32.mrb[91].mxu0  ;;  %2741 = vst [vmem:[%s4593_s3 + $0x680] sm:$0xff] %v1533_v56 }
 0x1e5   : > { %2669 = vst [vmem:[%s4593_s3 + $0x440] sm:$0xff] %v1011_v27  ;;  %3660 = vmatmul.mubr.msk.bf16.gmra.mrb[180].mxu1 %vm606_vm0, %v4957_v25 }
 0x1e6   : > { %3450 = vmatmul.mubr.msk.bf16.gmra.mrb[196].mxu0 %vm606_vm0, %v5072_v2  ;;  %3663 = vmatprep.mubr.msk.bf16.mxu1 %vm606_vm0, %v4975_v9 }
 0x1e7   : > { %3451 = vmatprep.mubr.msk.bf16.mxu0 %vm606_vm0, %v5092_v15 }
 0x1e8   : > { %v1537_v59 = vpop.f32.mrb[92].mxu1 }
 0x1e9   : > { %v1015_v57 = vpop.f32.mrb[92].mxu0  ;;  %2743 = vst [vmem:[%s4593_s3 + $0x690] sm:$0xff] %v1537_v59  ;;  %v1539_v54 = vpop.f32.mrb[93].mxu1 }
 0x1ea   : > { %2671 = vst [vmem:[%s4593_s3 + $0x450] sm:$0xff] %v1015_v57  ;;  %v1017_v25 = vpop.f32.mrb[93].mxu0  ;;  %2744 = vst [vmem:[%s4593_s3 + $0x698] sm:$0xff] %v1539_v54  ;;  %v1541_v9 = vpop.f32.mrb[94].mxu1 }
 0x1eb   : > { %2672 = vst [vmem:[%s4593_s3 + $0x458] sm:$0xff] %v1017_v25  ;;  %v1019_v62 = vpop.f32.mrb[94].mxu0  ;;  %2746 = vst [vmem:[%s4593_s3 + $0x6a8] sm:$0xff] %v1541_v9  ;;  %v1543_v3 = vpop.f32.mrb[95].mxu1 }
 0x1ec   : > { %2674 = vst [vmem:[%s4593_s3 + $0x468] sm:$0xff] %v1019_v62  ;;  %v1021_v41 = vpop.f32.mrb[95].mxu0  ;;  %2747 = vst [vmem:[%s4593_s3 + $0x6b0] sm:$0xff] %v1543_v3 }
 0x1ed   : > { %2675 = vst [vmem:[%s4593_s3 + $0x470] sm:$0xff] %v1021_v41  ;;  %3664 = vmatmul.mubr.msk.bf16.gmra.mrb[184].mxu1 %vm606_vm0, %v4992_v23 }
 0x1ee   : > { %3452 = vmatmul.mubr.msk.bf16.gmra.mrb[200].mxu0 %vm606_vm0, %v5092_v15  ;;  %3667 = vmatprep.mubr.msk.bf16.mxu1 %vm606_vm0, %v5012_v36 }
 0x1ef   : > { %3453 = vmatprep.mubr.msk.bf16.mxu0 %vm606_vm0, %v5112_v63 }
 0x1f0   : > { %v1547_v55 = vpop.f32.mrb[96].mxu1 }
 0x1f1   : > { %v3577_v7 = vpop.f32.mrb[96].mxu0  ;;  %2749 = vst [vmem:[%s4593_s3 + $0x6c0] sm:$0xff] %v1547_v55  ;;  %v1549_v23 = vpop.f32.mrb[97].mxu1 }
 0x1f2   : > { %2685 = vst [vmem:[%s4593_s3 + $0x4c0] sm:$0xff] %v3577_v7  ;;  %v1700_v19 = vpop.f32.mrb[97].mxu0  ;;  %2750 = vst [vmem:[%s4593_s3 + $0x6c8] sm:$0xff] %v1549_v23  ;;  %v1551_v8 = vpop.f32.mrb[98].mxu1 }
 0x1f3   : > { %2679 = vst [vmem:[%s4593_s3 + $0x490] sm:$0xff] %v1700_v19  ;;  %v3578_v36 = vpop.f32.mrb[98].mxu0  ;;  %2752 = vst [vmem:[%s4593_s3 + $0x6d8] sm:$0xff] %v1551_v8  ;;  %v1553_v43 = vpop.f32.mrb[99].mxu1 }
 0x1f4   : > { %2688 = vst [vmem:[%s4593_s3 + $0x4d8] sm:$0xff] %v3578_v36  ;;  %v1703_v47 = vpop.f32.mrb[99].mxu0  ;;  %2753 = vst [vmem:[%s4593_s3 + $0x6e0] sm:$0xff] %v1553_v43 }
 0x1f5   : > { %2682 = vst [vmem:[%s4593_s3 + $0x4a8] sm:$0xff] %v1703_v47  ;;  %3668 = vmatmul.mubr.msk.bf16.gmra.mrb[188].mxu1 %vm606_vm0, %v5032_v24 }
 0x1f6   : > { %3454 = vmatmul.mubr.msk.bf16.gmra.mrb[204].mxu0 %vm606_vm0, %v5112_v63  ;;  %3671 = vmatprep.mubr.msk.bf16.mxu1 %vm606_vm0, %v5052_v45 }
 0x1f7   : > { %3455 = vmatprep.mubr.msk.bf16.mxu0 %vm606_vm0, %v386_v11 }
 0x1f8   : > { %v1557_v39 = vpop.f32.mrb[100].mxu1 }
 0x1f9   : > { %v3581_v18 = vpop.f32.mrb[100].mxu0  ;;  %2755 = vst [vmem:[%s4593_s3 + $0x6f0] sm:$0xff] %v1557_v39  ;;  %v1559_v0 = vpop.f32.mrb[101].mxu1 }
 0x1fa   : > { %2697 = vst [vmem:[%s4593_s3 + $0x520] sm:$0xff] %v3581_v18  ;;  %v1716_v13 = vpop.f32.mrb[101].mxu0  ;;  %2756 = vst [vmem:[%s4593_s3 + $0x6f8] sm:$0xff] %v1559_v0  ;;  %v1561_v24 = vpop.f32.mrb[102].mxu1 }
 0x1fb   : > { %2691 = vst [vmem:[%s4593_s3 + $0x4f0] sm:$0xff] %v1716_v13  ;;  %v3582_v26 = vpop.f32.mrb[102].mxu0  ;;  %2758 = vst [vmem:[%s4593_s3 + $0x708] sm:$0xff] %v1561_v24  ;;  %v1563_v5 = vpop.f32.mrb[103].mxu1 }
 0x1fc   : > { %2700 = vst [vmem:[%s4593_s3 + $0x538] sm:$0xff] %v3582_v26  ;;  %v1719_v52 = vpop.f32.mrb[103].mxu0  ;;  %2759 = vst [vmem:[%s4593_s3 + $0x710] sm:$0xff] %v1563_v5 }
 0x1fd   : > { %2694 = vst [vmem:[%s4593_s3 + $0x508] sm:$0xff] %v1719_v52  ;;  %3672 = vmatmul.mubr.msk.bf16.gmra.mrb[192].mxu1 %vm606_vm0, %v5072_v2 }
 0x1fe   : > { %3456 = vmatmul.mubr.msk.bf16.gmra.mrb[208].mxu0 %vm606_vm0, %v386_v11  ;;  %3675 = vmatprep.mubr.msk.bf16.mxu1 %vm606_vm0, %v5092_v15 }
 0x1ff   : > { %3457 = vmatprep.mubr.msk.bf16.mxu0 %vm606_vm0, %v387_v46 }
 0x200   : > { %v1567_v60 = vpop.f32.mrb[104].mxu1 }
 0x201   : > { %v3585_v1 = vpop.f32.mrb[104].mxu0  ;;  %2761 = vst [vmem:[%s4593_s3 + $0x720] sm:$0xff] %v1567_v60  ;;  %v1569_v22 = vpop.f32.mrb[105].mxu1 }
 0x202   : > { %2709 = vst [vmem:[%s4593_s3 + $0x580] sm:$0xff] %v3585_v1  ;;  %v1732_v10 = vpop.f32.mrb[105].mxu0  ;;  %2762 = vst [vmem:[%s4593_s3 + $0x728] sm:$0xff] %v1569_v22  ;;  %v1571_v45 = vpop.f32.mrb[106].mxu1 }
 0x203   : > { %2703 = vst [vmem:[%s4593_s3 + $0x550] sm:$0xff] %v1732_v10  ;;  %v3586_v4 = vpop.f32.mrb[106].mxu0  ;;  %2764 = vst [vmem:[%s4593_s3 + $0x738] sm:$0xff] %v1571_v45  ;;  %v1573_v40 = vpop.f32.mrb[107].mxu1 }
 0x204   : > { %2712 = vst [vmem:[%s4593_s3 + $0x598] sm:$0xff] %v3586_v4  ;;  %v1735_v29 = vpop.f32.mrb[107].mxu0  ;;  %2765 = vst [vmem:[%s4593_s3 + $0x740] sm:$0xff] %v1573_v40 }
 0x205   : > { %2706 = vst [vmem:[%s4593_s3 + $0x568] sm:$0xff] %v1735_v29  ;;  %3676 = vmatmul.mubr.msk.bf16.gmra.mrb[196].mxu1 %vm606_vm0, %v5112_v63 }
 0x206   : > { %3458 = vmatmul.mubr.msk.bf16.gmra.mrb[212].mxu0 %vm606_vm0, %v387_v46  ;;  %3679 = vmatprep.mubr.msk.bf16.mxu1 %vm606_vm0, %v386_v11 }
 0x207   : > { %3459 = vmatprep.mubr.msk.bf16.mxu0 %vm606_vm0, %v388_v28 }
 0x208   : > { %v1577_v53 = vpop.f32.mrb[108].mxu1 }
 0x209   : > { %v3589_v33 = vpop.f32.mrb[108].mxu0  ;;  %2767 = vst [vmem:[%s4593_s3 + $0x750] sm:$0xff] %v1577_v53  ;;  %v1579_v34 = vpop.f32.mrb[109].mxu1 }
 0x20a   : > { %2721 = vst [vmem:[%s4593_s3 + $0x5e0] sm:$0xff] %v3589_v33  ;;  %v1748_v42 = vpop.f32.mrb[109].mxu0  ;;  %2768 = vst [vmem:[%s4593_s3 + $0x758] sm:$0xff] %v1579_v34  ;;  %v1581_v2 = vpop.f32.mrb[110].mxu1 }
 0x20b   : > { %2715 = vst [vmem:[%s4593_s3 + $0x5b0] sm:$0xff] %v1748_v42  ;;  %v3590_v35 = vpop.f32.mrb[110].mxu0  ;;  %2770 = vst [vmem:[%s4593_s3 + $0x768] sm:$0xff] %v1581_v2  ;;  %v1583_v31 = vpop.f32.mrb[111].mxu1 }
 0x20c   : > { %2724 = vst [vmem:[%s4593_s3 + $0x5f8] sm:$0xff] %v3590_v35  ;;  %v1751_v50 = vpop.f32.mrb[111].mxu0  ;;  %2771 = vst [vmem:[%s4593_s3 + $0x770] sm:$0xff] %v1583_v31 }
 0x20d   : > { %2718 = vst [vmem:[%s4593_s3 + $0x5c8] sm:$0xff] %v1751_v50  ;;  %3680 = vmatmul.mubr.msk.bf16.gmra.mrb[200].mxu1 %vm606_vm0, %v387_v46 }
 0x20e   : > { %3460 = vmatmul.mubr.msk.bf16.gmra.mrb[216].mxu0 %vm606_vm0, %v388_v28  ;;  %3683 = vmatprep.mubr.msk.bf16.mxu1 %vm606_vm0, %v388_v28 }
 0x20f   : > { %3461 = vmatprep.mubr.msk.bf16.mxu0 %vm606_vm0, %v389_v38 }
 0x210   : > { %v1587_v44 = vpop.f32.mrb[112].mxu1 }
 0x211   : > { %v3593_v49 = vpop.f32.mrb[112].mxu0  ;;  %2773 = vst [vmem:[%s4593_s3 + $0x780] sm:$0xff] %v1587_v44  ;;  %v1589_v61 = vpop.f32.mrb[113].mxu1 }
 0x212   : > { %2733 = vst [vmem:[%s4593_s3 + $0x640] sm:$0xff] %v3593_v49  ;;  %v1764_v58 = vpop.f32.mrb[113].mxu0  ;;  %2774 = vst [vmem:[%s4593_s3 + $0x788] sm:$0xff] %v1589_v61  ;;  %v1591_v51 = vpop.f32.mrb[114].mxu1 }
 0x213   : > { %2727 = vst [vmem:[%s4593_s3 + $0x610] sm:$0xff] %v1764_v58  ;;  %v3594_v16 = vpop.f32.mrb[114].mxu0  ;;  %2776 = vst [vmem:[%s4593_s3 + $0x798] sm:$0xff] %v1591_v51  ;;  %v1593_v15 = vpop.f32.mrb[115].mxu1 }
 0x214   : > { %2736 = vst [vmem:[%s4593_s3 + $0x658] sm:$0xff] %v3594_v16  ;;  %v1767_v27 = vpop.f32.mrb[115].mxu0  ;;  %2777 = vst [vmem:[%s4593_s3 + $0x7a0] sm:$0xff] %v1593_v15 }
 0x215   : > { %2730 = vst [vmem:[%s4593_s3 + $0x628] sm:$0xff] %v1767_v27  ;;  %3684 = vmatmul.mubr.msk.bf16.gmra.mrb[204].mxu1 %vm606_vm0, %v389_v38 }
 0x216   : > { %3462 = vmatmul.mubr.msk.bf16.gmra.mrb[220].mxu0 %vm606_vm0, %v389_v38 }
 0x218   : > { %v1597_v56 = vpop.f32.mrb[116].mxu1 }
 0x219   : > { %v3597_v37 = vpop.f32.mrb[116].mxu0  ;;  %2779 = vst [vmem:[%s4593_s3 + $0x7b0] sm:$0xff] %v1597_v56  ;;  %v1599_v21 = vpop.f32.mrb[117].mxu1 }
 0x21a   : > { %2745 = vst [vmem:[%s4593_s3 + $0x6a0] sm:$0xff] %v3597_v37  ;;  %v1780_v57 = vpop.f32.mrb[117].mxu0  ;;  %2780 = vst [vmem:[%s4593_s3 + $0x7b8] sm:$0xff] %v1599_v21  ;;  %v1601_v59 = vpop.f32.mrb[118].mxu1 }
 0x21b   : > { %2739 = vst [vmem:[%s4593_s3 + $0x670] sm:$0xff] %v1780_v57  ;;  %v3598_v25 = vpop.f32.mrb[118].mxu0  ;;  %2782 = vst [vmem:[%s4593_s3 + $0x7c8] sm:$0xff] %v1601_v59  ;;  %v1603_v54 = vpop.f32.mrb[119].mxu1 }
 0x21c   : > { %2748 = vst [vmem:[%s4593_s3 + $0x6b8] sm:$0xff] %v3598_v25  ;;  %v1783_v62 = vpop.f32.mrb[119].mxu0  ;;  %2783 = vst [vmem:[%s4593_s3 + $0x7d0] sm:$0xff] %v1603_v54 }
 0x21d   : > { %2742 = vst [vmem:[%s4593_s3 + $0x688] sm:$0xff] %v1783_v62 }
 0x220   : > { %v1607_v9 = vpop.f32.mrb[120].mxu1 }
 0x221   : > { %v3601_v63 = vpop.f32.mrb[120].mxu0  ;;  %2785 = vst [vmem:[%s4593_s3 + $0x7e0] sm:$0xff] %v1607_v9  ;;  %v1609_v41 = vpop.f32.mrb[121].mxu1 }
 0x222   : > { %2757 = vst [vmem:[%s4593_s3 + $0x700] sm:$0xff] %v3601_v63  ;;  %v1796_v3 = vpop.f32.mrb[121].mxu0  ;;  %2786 = vst [vmem:[%s4593_s3 + $0x7e8] sm:$0xff] %v1609_v41  ;;  %v1611_v6 = vpop.f32.mrb[122].mxu1 }
 0x223   : > { %2751 = vst [vmem:[%s4593_s3 + $0x6d0] sm:$0xff] %v1796_v3  ;;  %v3602_v30 = vpop.f32.mrb[122].mxu0  ;;  %2788 = vst [vmem:[%s4593_s3 + $0x7f8] sm:$0xff] %v1611_v6  ;;  %v1613_v55 = vpop.f32.mrb[123].mxu1 }
 0x224   : > { %2760 = vst [vmem:[%s4593_s3 + $0x718] sm:$0xff] %v3602_v30  ;;  %v1799_v7 = vpop.f32.mrb[123].mxu0  ;;  %2789 = vst [vmem:[%s4593_s3 + $0x800] sm:$0xff] %v1613_v55 }
 0x225   : > { %2754 = vst [vmem:[%s4593_s3 + $0x6e8] sm:$0xff] %v1799_v7 }
 0x228   : > { %v1617_v23 = vpop.f32.mrb[124].mxu1 }
 0x229   : > { %v3605_v19 = vpop.f32.mrb[124].mxu0  ;;  %2791 = vst [vmem:[%s4593_s3 + $0x810] sm:$0xff] %v1617_v23  ;;  %v1619_v8 = vpop.f32.mrb[125].mxu1 }
 0x22a   : > { %2769 = vst [vmem:[%s4593_s3 + $0x760] sm:$0xff] %v3605_v19  ;;  %v1812_v36 = vpop.f32.mrb[125].mxu0  ;;  %2792 = vst [vmem:[%s4593_s3 + $0x818] sm:$0xff] %v1619_v8  ;;  %v1621_v11 = vpop.f32.mrb[126].mxu1 }
 0x22b   : > { %2763 = vst [vmem:[%s4593_s3 + $0x730] sm:$0xff] %v1812_v36  ;;  %v3606_v43 = vpop.f32.mrb[126].mxu0  ;;  %2794 = vst [vmem:[%s4593_s3 + $0x828] sm:$0xff] %v1621_v11  ;;  %v1623_v47 = vpop.f32.mrb[127].mxu1 }
 0x22c   : > { %2772 = vst [vmem:[%s4593_s3 + $0x778] sm:$0xff] %v3606_v43  ;;  %v1815_v12 = vpop.f32.mrb[127].mxu0  ;;  %2795 = vst [vmem:[%s4593_s3 + $0x830] sm:$0xff] %v1623_v47 }
 0x22d   : > { %2766 = vst [vmem:[%s4593_s3 + $0x748] sm:$0xff] %v1815_v12 }
 0x230   : > { %v1627_v17 = vpop.f32.mrb[128].mxu1 }
 0x231   : > { %v2069_v39 = vpop.f32.mrb[128].mxu0  ;;  %2797 = vst [vmem:[%s4593_s3 + $0x840] sm:$0xff] %v1627_v17  ;;  %v1629_v18 = vpop.f32.mrb[129].mxu1 }
 0x232   : > { %2821 = vst [vmem:[%s4593_s3 + $0x900] sm:$0xff] %v2069_v39  ;;  %v2071_v0 = vpop.f32.mrb[129].mxu0  ;;  %2798 = vst [vmem:[%s4593_s3 + $0x848] sm:$0xff] %v1629_v18  ;;  %v1631_v13 = vpop.f32.mrb[130].mxu1 }
 0x233   : > { %2822 = vst [vmem:[%s4593_s3 + $0x908] sm:$0xff] %v2071_v0  ;;  %v2073_v24 = vpop.f32.mrb[130].mxu0  ;;  %2800 = vst [vmem:[%s4593_s3 + $0x858] sm:$0xff] %v1631_v13  ;;  %v1633_v26 = vpop.f32.mrb[131].mxu1 }
 0x234   : > { %2824 = vst [vmem:[%s4593_s3 + $0x918] sm:$0xff] %v2073_v24  ;;  %v2075_v46 = vpop.f32.mrb[131].mxu0  ;;  %2801 = vst [vmem:[%s4593_s3 + $0x860] sm:$0xff] %v1633_v26 }
 0x235   : > { %2825 = vst [vmem:[%s4593_s3 + $0x920] sm:$0xff] %v2075_v46 }
 0x238   : > { %v1637_v5 = vpop.f32.mrb[132].mxu1 }
 0x239   : > { %v2079_v52 = vpop.f32.mrb[132].mxu0  ;;  %2803 = vst [vmem:[%s4593_s3 + $0x870] sm:$0xff] %v1637_v5  ;;  %v1639_v20 = vpop.f32.mrb[133].mxu1 }
 0x23a   : > { %2827 = vst [vmem:[%s4593_s3 + $0x930] sm:$0xff] %v2079_v52  ;;  %v2081_v48 = vpop.f32.mrb[133].mxu0  ;;  %2804 = vst [vmem:[%s4593_s3 + $0x878] sm:$0xff] %v1639_v20  ;;  %v1641_v60 = vpop.f32.mrb[134].mxu1 }
 0x23b   : > { %2828 = vst [vmem:[%s4593_s3 + $0x938] sm:$0xff] %v2081_v48  ;;  %v2083_v1 = vpop.f32.mrb[134].mxu0  ;;  %2806 = vst [vmem:[%s4593_s3 + $0x888] sm:$0xff] %v1641_v60  ;;  %v1643_v22 = vpop.f32.mrb[135].mxu1 }
 0x23c   : > { %2830 = vst [vmem:[%s4593_s3 + $0x948] sm:$0xff] %v2083_v1  ;;  %v2085_v10 = vpop.f32.mrb[135].mxu0  ;;  %2807 = vst [vmem:[%s4593_s3 + $0x890] sm:$0xff] %v1643_v22 }
 0x23d   : > { %2831 = vst [vmem:[%s4593_s3 + $0x950] sm:$0xff] %v2085_v10 }
 0x240   : > { %v1647_v45 = vpop.f32.mrb[136].mxu1 }
 0x241   : > { %v2089_v4 = vpop.f32.mrb[136].mxu0  ;;  %2809 = vst [vmem:[%s4593_s3 + $0x8a0] sm:$0xff] %v1647_v45  ;;  %v1649_v28 = vpop.f32.mrb[137].mxu1 }
 0x242   : > { %2833 = vst [vmem:[%s4593_s3 + $0x960] sm:$0xff] %v2089_v4  ;;  %v2091_v40 = vpop.f32.mrb[137].mxu0  ;;  %2810 = vst [vmem:[%s4593_s3 + $0x8a8] sm:$0xff] %v1649_v28  ;;  %v1651_v29 = vpop.f32.mrb[138].mxu1 }
 0x243   : > { %2834 = vst [vmem:[%s4593_s3 + $0x968] sm:$0xff] %v2091_v40  ;;  %v2093_v14 = vpop.f32.mrb[138].mxu0  ;;  %2812 = vst [vmem:[%s4593_s3 + $0x8b8] sm:$0xff] %v1651_v29  ;;  %v1653_v32 = vpop.f32.mrb[139].mxu1 }
 0x244   : > { %2836 = vst [vmem:[%s4593_s3 + $0x978] sm:$0xff] %v2093_v14  ;;  %v2095_v53 = vpop.f32.mrb[139].mxu0  ;;  %2813 = vst [vmem:[%s4593_s3 + $0x8c0] sm:$0xff] %v1653_v32 }
 0x245   : > { %2837 = vst [vmem:[%s4593_s3 + $0x980] sm:$0xff] %v2095_v53 }
 0x248   : > { %v1657_v33 = vpop.f32.mrb[140].mxu1 }
 0x249   : > { %v2099_v34 = vpop.f32.mrb[140].mxu0  ;;  %2815 = vst [vmem:[%s4593_s3 + $0x8d0] sm:$0xff] %v1657_v33  ;;  %v1659_v42 = vpop.f32.mrb[141].mxu1 }
 0x24a   : > { %2839 = vst [vmem:[%s4593_s3 + $0x990] sm:$0xff] %v2099_v34  ;;  %v2101_v2 = vpop.f32.mrb[141].mxu0  ;;  %2816 = vst [vmem:[%s4593_s3 + $0x8d8] sm:$0xff] %v1659_v42  ;;  %v1661_v35 = vpop.f32.mrb[142].mxu1 }
 0x24b   : > { %2840 = vst [vmem:[%s4593_s3 + $0x998] sm:$0xff] %v2101_v2  ;;  %v2103_v38 = vpop.f32.mrb[142].mxu0  ;;  %2818 = vst [vmem:[%s4593_s3 + $0x8e8] sm:$0xff] %v1661_v35  ;;  %v1663_v31 = vpop.f32.mrb[143].mxu1 }
 0x24c   : > { %2842 = vst [vmem:[%s4593_s3 + $0x9a8] sm:$0xff] %v2103_v38  ;;  %v2105_v50 = vpop.f32.mrb[143].mxu0  ;;  %2819 = vst [vmem:[%s4593_s3 + $0x8f0] sm:$0xff] %v1663_v31 }
 0x24d   : > { %2843 = vst [vmem:[%s4593_s3 + $0x9b0] sm:$0xff] %v2105_v50 }
 0x250   : > { %v3609_v44 = vpop.f32.mrb[144].mxu1 }
 0x251   : > { %v2109_v49 = vpop.f32.mrb[144].mxu0  ;;  %2781 = vst [vmem:[%s4593_s3 + $0x7c0] sm:$0xff] %v3609_v44  ;;  %v1828_v61 = vpop.f32.mrb[145].mxu1 }
 0x252   : > { %2845 = vst [vmem:[%s4593_s3 + $0x9c0] sm:$0xff] %v2109_v49  ;;  %v2111_v58 = vpop.f32.mrb[145].mxu0  ;;  %2775 = vst [vmem:[%s4593_s3 + $0x790] sm:$0xff] %v1828_v61  ;;  %v3610_v51 = vpop.f32.mrb[146].mxu1 }
 0x253   : > { %2846 = vst [vmem:[%s4593_s3 + $0x9c8] sm:$0xff] %v2111_v58  ;;  %v2113_v16 = vpop.f32.mrb[146].mxu0  ;;  %2784 = vst [vmem:[%s4593_s3 + $0x7d8] sm:$0xff] %v3610_v51  ;;  %v1831_v15 = vpop.f32.mrb[147].mxu1 }
 0x254   : > { %2848 = vst [vmem:[%s4593_s3 + $0x9d8] sm:$0xff] %v2113_v16  ;;  %v2115_v27 = vpop.f32.mrb[147].mxu0  ;;  %2778 = vst [vmem:[%s4593_s3 + $0x7a8] sm:$0xff] %v1831_v15 }
 0x255   : > { %2849 = vst [vmem:[%s4593_s3 + $0x9e0] sm:$0xff] %v2115_v27 }
 0x258   : > { %v3613_v37 = vpop.f32.mrb[148].mxu1 }
 0x259   : > { %v2119_v56 = vpop.f32.mrb[148].mxu0  ;;  %2793 = vst [vmem:[%s4593_s3 + $0x820] sm:$0xff] %v3613_v37  ;;  %v1844_v57 = vpop.f32.mrb[149].mxu1 }
 0x25a   : > { %2851 = vst [vmem:[%s4593_s3 + $0x9f0] sm:$0xff] %v2119_v56  ;;  %v2121_v21 = vpop.f32.mrb[149].mxu0  ;;  %2787 = vst [vmem:[%s4593_s3 + $0x7f0] sm:$0xff] %v1844_v57  ;;  %v3614_v25 = vpop.f32.mrb[150].mxu1 }
 0x25b   : > { %2852 = vst [vmem:[%s4593_s3 + $0x9f8] sm:$0xff] %v2121_v21  ;;  %v2123_v59 = vpop.f32.mrb[150].mxu0  ;;  %2796 = vst [vmem:[%s4593_s3 + $0x838] sm:$0xff] %v3614_v25  ;;  %v1847_v62 = vpop.f32.mrb[151].mxu1 }
 0x25c   : > { %2854 = vst [vmem:[%s4593_s3 + $0xa08] sm:$0xff] %v2123_v59  ;;  %v2125_v54 = vpop.f32.mrb[151].mxu0  ;;  %2790 = vst [vmem:[%s4593_s3 + $0x808] sm:$0xff] %v1847_v62 }
 0x25d   : > { %2855 = vst [vmem:[%s4593_s3 + $0xa10] sm:$0xff] %v2125_v54 }
 0x260   : > { %v3617_v63 = vpop.f32.mrb[152].mxu1 }
 0x261   : > { %v2129_v9 = vpop.f32.mrb[152].mxu0  ;;  %2805 = vst [vmem:[%s4593_s3 + $0x880] sm:$0xff] %v3617_v63  ;;  %v1860_v3 = vpop.f32.mrb[153].mxu1 }
 0x262   : > { %2857 = vst [vmem:[%s4593_s3 + $0xa20] sm:$0xff] %v2129_v9  ;;  %v2131_v41 = vpop.f32.mrb[153].mxu0  ;;  %2799 = vst [vmem:[%s4593_s3 + $0x850] sm:$0xff] %v1860_v3  ;;  %v3618_v30 = vpop.f32.mrb[154].mxu1 }
 0x263   : > { %2858 = vst [vmem:[%s4593_s3 + $0xa28] sm:$0xff] %v2131_v41  ;;  %v2133_v6 = vpop.f32.mrb[154].mxu0  ;;  %2808 = vst [vmem:[%s4593_s3 + $0x898] sm:$0xff] %v3618_v30  ;;  %v1863_v7 = vpop.f32.mrb[155].mxu1 }
 0x264   : > { %2860 = vst [vmem:[%s4593_s3 + $0xa38] sm:$0xff] %v2133_v6  ;;  %v2135_v55 = vpop.f32.mrb[155].mxu0  ;;  %2802 = vst [vmem:[%s4593_s3 + $0x868] sm:$0xff] %v1863_v7 }
 0x265   : > { %2861 = vst [vmem:[%s4593_s3 + $0xa40] sm:$0xff] %v2135_v55 }
 0x268   : > { %v3621_v19 = vpop.f32.mrb[156].mxu1 }
 0x269   : > { %v2139_v23 = vpop.f32.mrb[156].mxu0  ;;  %2817 = vst [vmem:[%s4593_s3 + $0x8e0] sm:$0xff] %v3621_v19  ;;  %v1876_v36 = vpop.f32.mrb[157].mxu1 }
 0x26a   : > { %2863 = vst [vmem:[%s4593_s3 + $0xa50] sm:$0xff] %v2139_v23  ;;  %v2141_v8 = vpop.f32.mrb[157].mxu0  ;;  %2811 = vst [vmem:[%s4593_s3 + $0x8b0] sm:$0xff] %v1876_v36  ;;  %v3622_v43 = vpop.f32.mrb[158].mxu1 }
 0x26b   : > { %2864 = vst [vmem:[%s4593_s3 + $0xa58] sm:$0xff] %v2141_v8  ;;  %v2143_v11 = vpop.f32.mrb[158].mxu0  ;;  %2820 = vst [vmem:[%s4593_s3 + $0x8f8] sm:$0xff] %v3622_v43  ;;  %v1879_v12 = vpop.f32.mrb[159].mxu1 }
 0x26c   : > { %2866 = vst [vmem:[%s4593_s3 + $0xa68] sm:$0xff] %v2143_v11  ;;  %v2145_v47 = vpop.f32.mrb[159].mxu0  ;;  %2814 = vst [vmem:[%s4593_s3 + $0x8c8] sm:$0xff] %v1879_v12 }
 0x26d   : > { %2867 = vst [vmem:[%s4593_s3 + $0xa70] sm:$0xff] %v2145_v47 }
 0x271   : > { %v2149_v17 = vpop.f32.mrb[160].mxu0 }
 0x272   : > { %2869 = vst [vmem:[%s4593_s3 + $0xa80] sm:$0xff] %v2149_v17  ;;  %v2151_v39 = vpop.f32.mrb[161].mxu0 }
 0x273   : > { %2870 = vst [vmem:[%s4593_s3 + $0xa88] sm:$0xff] %v2151_v39  ;;  %v2153_v18 = vpop.f32.mrb[162].mxu0 }
 0x274   : > { %2872 = vst [vmem:[%s4593_s3 + $0xa98] sm:$0xff] %v2153_v18  ;;  %v2155_v0 = vpop.f32.mrb[163].mxu0 }
 0x275   : > { %2873 = vst [vmem:[%s4593_s3 + $0xaa0] sm:$0xff] %v2155_v0 }
 0x279   : > { %v2159_v13 = vpop.f32.mrb[164].mxu0 }
 0x27a   : > { %2875 = vst [vmem:[%s4593_s3 + $0xab0] sm:$0xff] %v2159_v13  ;;  %v2161_v24 = vpop.f32.mrb[165].mxu0 }
 0x27b   : > { %2876 = vst [vmem:[%s4593_s3 + $0xab8] sm:$0xff] %v2161_v24  ;;  %v2163_v26 = vpop.f32.mrb[166].mxu0 }
 0x27c   : > { %2878 = vst [vmem:[%s4593_s3 + $0xac8] sm:$0xff] %v2163_v26  ;;  %v2165_v46 = vpop.f32.mrb[167].mxu0 }
 0x27d   : > { %2879 = vst [vmem:[%s4593_s3 + $0xad0] sm:$0xff] %v2165_v46 }
 0x281   : > { %v2169_v5 = vpop.f32.mrb[168].mxu0 }
 0x282   : > { %2881 = vst [vmem:[%s4593_s3 + $0xae0] sm:$0xff] %v2169_v5  ;;  %v2171_v52 = vpop.f32.mrb[169].mxu0 }
 0x283   : > { %2882 = vst [vmem:[%s4593_s3 + $0xae8] sm:$0xff] %v2171_v52  ;;  %v2173_v20 = vpop.f32.mrb[170].mxu0 }
 0x284   : > { %2884 = vst [vmem:[%s4593_s3 + $0xaf8] sm:$0xff] %v2173_v20  ;;  %v2175_v48 = vpop.f32.mrb[171].mxu0 }
 0x285   : > { %2885 = vst [vmem:[%s4593_s3 + $0xb00] sm:$0xff] %v2175_v48 }
 0x289   : > { %v2179_v60 = vpop.f32.mrb[172].mxu0 }
 0x28a   : > { %2887 = vst [vmem:[%s4593_s3 + $0xb10] sm:$0xff] %v2179_v60  ;;  %v2181_v1 = vpop.f32.mrb[173].mxu0 }
 0x28b   : > { %2888 = vst [vmem:[%s4593_s3 + $0xb18] sm:$0xff] %v2181_v1  ;;  %v2183_v22 = vpop.f32.mrb[174].mxu0 }
 0x28c   : > { %2890 = vst [vmem:[%s4593_s3 + $0xb28] sm:$0xff] %v2183_v22  ;;  %v2185_v10 = vpop.f32.mrb[175].mxu0 }
 0x28d   : > { %2891 = vst [vmem:[%s4593_s3 + $0xb30] sm:$0xff] %v2185_v10 }
 0x290   : > { %v3641_v45 = vpop.f32.mrb[160].mxu1 }
 0x291   : > { %v2189_v4 = vpop.f32.mrb[176].mxu0  ;;  %2829 = vst [vmem:[%s4593_s3 + $0x940] sm:$0xff] %v3641_v45  ;;  %v2342_v28 = vpop.f32.mrb[161].mxu1 }
 0x292   : > { %2893 = vst [vmem:[%s4593_s3 + $0xb40] sm:$0xff] %v2189_v4  ;;  %v2191_v40 = vpop.f32.mrb[177].mxu0  ;;  %2823 = vst [vmem:[%s4593_s3 + $0x910] sm:$0xff] %v2342_v28  ;;  %v3642_v29 = vpop.f32.mrb[162].mxu1 }
 0x293   : > { %2894 = vst [vmem:[%s4593_s3 + $0xb48] sm:$0xff] %v2191_v40  ;;  %v2193_v14 = vpop.f32.mrb[178].mxu0  ;;  %2832 = vst [vmem:[%s4593_s3 + $0x958] sm:$0xff] %v3642_v29  ;;  %v2345_v32 = vpop.f32.mrb[163].mxu1 }
 0x294   : > { %2896 = vst [vmem:[%s4593_s3 + $0xb58] sm:$0xff] %v2193_v14  ;;  %v2195_v53 = vpop.f32.mrb[179].mxu0  ;;  %2826 = vst [vmem:[%s4593_s3 + $0x928] sm:$0xff] %v2345_v32 }
 0x295   : > { %2897 = vst [vmem:[%s4593_s3 + $0xb60] sm:$0xff] %v2195_v53 }
 0x298   : > { %v3645_v33 = vpop.f32.mrb[164].mxu1 }
 0x299   : > { %v2199_v34 = vpop.f32.mrb[180].mxu0  ;;  %2841 = vst [vmem:[%s4593_s3 + $0x9a0] sm:$0xff] %v3645_v33  ;;  %v2358_v42 = vpop.f32.mrb[165].mxu1 }
 0x29a   : > { %2899 = vst [vmem:[%s4593_s3 + $0xb70] sm:$0xff] %v2199_v34  ;;  %v2201_v2 = vpop.f32.mrb[181].mxu0  ;;  %2835 = vst [vmem:[%s4593_s3 + $0x970] sm:$0xff] %v2358_v42  ;;  %v3646_v35 = vpop.f32.mrb[166].mxu1 }
 0x29b   : > { %2900 = vst [vmem:[%s4593_s3 + $0xb78] sm:$0xff] %v2201_v2  ;;  %v2203_v38 = vpop.f32.mrb[182].mxu0  ;;  %2844 = vst [vmem:[%s4593_s3 + $0x9b8] sm:$0xff] %v3646_v35  ;;  %v2361_v31 = vpop.f32.mrb[167].mxu1 }
 0x29c   : > { %2902 = vst [vmem:[%s4593_s3 + $0xb88] sm:$0xff] %v2203_v38  ;;  %v2205_v50 = vpop.f32.mrb[183].mxu0  ;;  %2838 = vst [vmem:[%s4593_s3 + $0x988] sm:$0xff] %v2361_v31 }
 0x29d   : > { %2903 = vst [vmem:[%s4593_s3 + $0xb90] sm:$0xff] %v2205_v50 }
 0x2a0   : > { %v3649_v44 = vpop.f32.mrb[168].mxu1 }
 0x2a1   : > { %v2209_v49 = vpop.f32.mrb[184].mxu0  ;;  %2853 = vst [vmem:[%s4593_s3 + $0xa00] sm:$0xff] %v3649_v44  ;;  %v2374_v61 = vpop.f32.mrb[169].mxu1 }
 0x2a2   : > { %2905 = vst [vmem:[%s4593_s3 + $0xba0] sm:$0xff] %v2209_v49  ;;  %v2211_v58 = vpop.f32.mrb[185].mxu0  ;;  %2847 = vst [vmem:[%s4593_s3 + $0x9d0] sm:$0xff] %v2374_v61  ;;  %v3650_v51 = vpop.f32.mrb[170].mxu1 }
 0x2a3   : > { %2906 = vst [vmem:[%s4593_s3 + $0xba8] sm:$0xff] %v2211_v58  ;;  %v2213_v16 = vpop.f32.mrb[186].mxu0  ;;  %2856 = vst [vmem:[%s4593_s3 + $0xa18] sm:$0xff] %v3650_v51  ;;  %v2377_v15 = vpop.f32.mrb[171].mxu1 }
 0x2a4   : > { %2908 = vst [vmem:[%s4593_s3 + $0xbb8] sm:$0xff] %v2213_v16  ;;  %v2215_v27 = vpop.f32.mrb[187].mxu0  ;;  %2850 = vst [vmem:[%s4593_s3 + $0x9e8] sm:$0xff] %v2377_v15 }
 0x2a5   : > { %2909 = vst [vmem:[%s4593_s3 + $0xbc0] sm:$0xff] %v2215_v27 }
 0x2a8   : > { %v3653_v56 = vpop.f32.mrb[172].mxu1 }
 0x2a9   : > { %v2219_v37 = vpop.f32.mrb[188].mxu0  ;;  %2865 = vst [vmem:[%s4593_s3 + $0xa60] sm:$0xff] %v3653_v56  ;;  %v2390_v21 = vpop.f32.mrb[173].mxu1 }
 0x2aa   : > { %2911 = vst [vmem:[%s4593_s3 + $0xbd0] sm:$0xff] %v2219_v37  ;;  %v2221_v57 = vpop.f32.mrb[189].mxu0  ;;  %2859 = vst [vmem:[%s4593_s3 + $0xa30] sm:$0xff] %v2390_v21  ;;  %v3654_v59 = vpop.f32.mrb[174].mxu1 }
 0x2ab   : > { %2912 = vst [vmem:[%s4593_s3 + $0xbd8] sm:$0xff] %v2221_v57  ;;  %v2223_v25 = vpop.f32.mrb[190].mxu0  ;;  %2868 = vst [vmem:[%s4593_s3 + $0xa78] sm:$0xff] %v3654_v59  ;;  %v2393_v54 = vpop.f32.mrb[175].mxu1 }
 0x2ac   : > { %2914 = vst [vmem:[%s4593_s3 + $0xbe8] sm:$0xff] %v2223_v25  ;;  %v2225_v62 = vpop.f32.mrb[191].mxu0  ;;  %2862 = vst [vmem:[%s4593_s3 + $0xa48] sm:$0xff] %v2393_v54 }
 0x2ad   : > { %2915 = vst [vmem:[%s4593_s3 + $0xbf0] sm:$0xff] %v2225_v62 }
 0x2b0   : > { %v3657_v9 = vpop.f32.mrb[176].mxu1 }
 0x2b1   : > { %v2229_v63 = vpop.f32.mrb[192].mxu0  ;;  %2877 = vst [vmem:[%s4593_s3 + $0xac0] sm:$0xff] %v3657_v9  ;;  %v2406_v41 = vpop.f32.mrb[177].mxu1 }
 0x2b2   : > { %2917 = vst [vmem:[%s4593_s3 + $0xc00] sm:$0xff] %v2229_v63  ;;  %v2231_v3 = vpop.f32.mrb[193].mxu0  ;;  %2871 = vst [vmem:[%s4593_s3 + $0xa90] sm:$0xff] %v2406_v41  ;;  %v3658_v6 = vpop.f32.mrb[178].mxu1 }
 0x2b3   : > { %2918 = vst [vmem:[%s4593_s3 + $0xc08] sm:$0xff] %v2231_v3  ;;  %v2233_v30 = vpop.f32.mrb[194].mxu0  ;;  %2880 = vst [vmem:[%s4593_s3 + $0xad8] sm:$0xff] %v3658_v6  ;;  %v2409_v55 = vpop.f32.mrb[179].mxu1 }
 0x2b4   : > { %2920 = vst [vmem:[%s4593_s3 + $0xc18] sm:$0xff] %v2233_v30  ;;  %v2235_v7 = vpop.f32.mrb[195].mxu0  ;;  %2874 = vst [vmem:[%s4593_s3 + $0xaa8] sm:$0xff] %v2409_v55 }
 0x2b5   : > { %2921 = vst [vmem:[%s4593_s3 + $0xc20] sm:$0xff] %v2235_v7 }
 0x2b8   : > { %v3661_v23 = vpop.f32.mrb[180].mxu1 }
 0x2b9   : > { %v2239_v19 = vpop.f32.mrb[196].mxu0  ;;  %2889 = vst [vmem:[%s4593_s3 + $0xb20] sm:$0xff] %v3661_v23  ;;  %v2422_v8 = vpop.f32.mrb[181].mxu1 }
 0x2ba   : > { %2923 = vst [vmem:[%s4593_s3 + $0xc30] sm:$0xff] %v2239_v19  ;;  %v2241_v36 = vpop.f32.mrb[197].mxu0  ;;  %2883 = vst [vmem:[%s4593_s3 + $0xaf0] sm:$0xff] %v2422_v8  ;;  %v3662_v11 = vpop.f32.mrb[182].mxu1 }
 0x2bb   : > { %2924 = vst [vmem:[%s4593_s3 + $0xc38] sm:$0xff] %v2241_v36  ;;  %v2243_v43 = vpop.f32.mrb[198].mxu0  ;;  %2892 = vst [vmem:[%s4593_s3 + $0xb38] sm:$0xff] %v3662_v11  ;;  %v2425_v47 = vpop.f32.mrb[183].mxu1 }
 0x2bc   : > { %2926 = vst [vmem:[%s4593_s3 + $0xc48] sm:$0xff] %v2243_v43  ;;  %v2245_v12 = vpop.f32.mrb[199].mxu0  ;;  %2886 = vst [vmem:[%s4593_s3 + $0xb08] sm:$0xff] %v2425_v47 }
 0x2bd   : > { %2927 = vst [vmem:[%s4593_s3 + $0xc50] sm:$0xff] %v2245_v12 }
 0x2c0   : > { %v3665_v17 = vpop.f32.mrb[184].mxu1 }
 0x2c1   : > { %v2249_v39 = vpop.f32.mrb[200].mxu0  ;;  %2901 = vst [vmem:[%s4593_s3 + $0xb80] sm:$0xff] %v3665_v17  ;;  %v2438_v18 = vpop.f32.mrb[185].mxu1 }
 0x2c2   : > { %2929 = vst [vmem:[%s4593_s3 + $0xc60] sm:$0xff] %v2249_v39  ;;  %v2251_v0 = vpop.f32.mrb[201].mxu0  ;;  %2895 = vst [vmem:[%s4593_s3 + $0xb50] sm:$0xff] %v2438_v18  ;;  %v3666_v13 = vpop.f32.mrb[186].mxu1 }
 0x2c3   : > { %2930 = vst [vmem:[%s4593_s3 + $0xc68] sm:$0xff] %v2251_v0  ;;  %v2253_v24 = vpop.f32.mrb[202].mxu0  ;;  %2904 = vst [vmem:[%s4593_s3 + $0xb98] sm:$0xff] %v3666_v13  ;;  %v2441_v26 = vpop.f32.mrb[187].mxu1 }
 0x2c4   : > { %2932 = vst [vmem:[%s4593_s3 + $0xc78] sm:$0xff] %v2253_v24  ;;  %v2255_v46 = vpop.f32.mrb[203].mxu0  ;;  %2898 = vst [vmem:[%s4593_s3 + $0xb68] sm:$0xff] %v2441_v26 }
 0x2c5   : > { %2933 = vst [vmem:[%s4593_s3 + $0xc80] sm:$0xff] %v2255_v46 }
 0x2c8   : > { %v3669_v5 = vpop.f32.mrb[188].mxu1 }
 0x2c9   : > { %v2259_v52 = vpop.f32.mrb[204].mxu0  ;;  %2913 = vst [vmem:[%s4593_s3 + $0xbe0] sm:$0xff] %v3669_v5  ;;  %v2454_v20 = vpop.f32.mrb[189].mxu1 }
 0x2ca   : > { %2935 = vst [vmem:[%s4593_s3 + $0xc90] sm:$0xff] %v2259_v52  ;;  %v2261_v48 = vpop.f32.mrb[205].mxu0  ;;  %2907 = vst [vmem:[%s4593_s3 + $0xbb0] sm:$0xff] %v2454_v20  ;;  %v3670_v60 = vpop.f32.mrb[190].mxu1 }
 0x2cb   : > { %2936 = vst [vmem:[%s4593_s3 + $0xc98] sm:$0xff] %v2261_v48  ;;  %v2263_v1 = vpop.f32.mrb[206].mxu0  ;;  %2916 = vst [vmem:[%s4593_s3 + $0xbf8] sm:$0xff] %v3670_v60  ;;  %v2457_v22 = vpop.f32.mrb[191].mxu1 }
 0x2cc   : > { %2938 = vst [vmem:[%s4593_s3 + $0xca8] sm:$0xff] %v2263_v1  ;;  %v2265_v10 = vpop.f32.mrb[207].mxu0  ;;  %2910 = vst [vmem:[%s4593_s3 + $0xbc8] sm:$0xff] %v2457_v22 }
 0x2cd   : > { %2939 = vst [vmem:[%s4593_s3 + $0xcb0] sm:$0xff] %v2265_v10 }
 0x2d0   : > { %v3673_v45 = vpop.f32.mrb[192].mxu1 }
 0x2d1   : > { %v2269_v4 = vpop.f32.mrb[208].mxu0  ;;  %2925 = vst [vmem:[%s4593_s3 + $0xc40] sm:$0xff] %v3673_v45  ;;  %v2470_v28 = vpop.f32.mrb[193].mxu1 }
 0x2d2   : > { %2941 = vst [vmem:[%s4593_s3 + $0xcc0] sm:$0xff] %v2269_v4  ;;  %v2271_v40 = vpop.f32.mrb[209].mxu0  ;;  %2919 = vst [vmem:[%s4593_s3 + $0xc10] sm:$0xff] %v2470_v28  ;;  %v3674_v29 = vpop.f32.mrb[194].mxu1 }
 0x2d3   : > { %2942 = vst [vmem:[%s4593_s3 + $0xcc8] sm:$0xff] %v2271_v40  ;;  %v2273_v14 = vpop.f32.mrb[210].mxu0  ;;  %2928 = vst [vmem:[%s4593_s3 + $0xc58] sm:$0xff] %v3674_v29  ;;  %v2473_v32 = vpop.f32.mrb[195].mxu1 }
 0x2d4   : > { %2944 = vst [vmem:[%s4593_s3 + $0xcd8] sm:$0xff] %v2273_v14  ;;  %v2275_v53 = vpop.f32.mrb[211].mxu0  ;;  %2922 = vst [vmem:[%s4593_s3 + $0xc28] sm:$0xff] %v2473_v32 }
 0x2d5   : > { %2945 = vst [vmem:[%s4593_s3 + $0xce0] sm:$0xff] %v2275_v53 }
 0x2d8   : > { %v3677_v33 = vpop.f32.mrb[196].mxu1 }
 0x2d9   : > { %v2279_v34 = vpop.f32.mrb[212].mxu0  ;;  %2937 = vst [vmem:[%s4593_s3 + $0xca0] sm:$0xff] %v3677_v33  ;;  %v2486_v42 = vpop.f32.mrb[197].mxu1 }
 0x2da   : > { %2947 = vst [vmem:[%s4593_s3 + $0xcf0] sm:$0xff] %v2279_v34  ;;  %v2281_v2 = vpop.f32.mrb[213].mxu0  ;;  %2931 = vst [vmem:[%s4593_s3 + $0xc70] sm:$0xff] %v2486_v42  ;;  %v3678_v35 = vpop.f32.mrb[198].mxu1 }
 0x2db   : > { %2948 = vst [vmem:[%s4593_s3 + $0xcf8] sm:$0xff] %v2281_v2  ;;  %v2283_v38 = vpop.f32.mrb[214].mxu0  ;;  %2940 = vst [vmem:[%s4593_s3 + $0xcb8] sm:$0xff] %v3678_v35  ;;  %v2489_v31 = vpop.f32.mrb[199].mxu1 }
 0x2dc   : > { %2950 = vst [vmem:[%s4593_s3 + $0xd08] sm:$0xff] %v2283_v38  ;;  %v2285_v50 = vpop.f32.mrb[215].mxu0  ;;  %2934 = vst [vmem:[%s4593_s3 + $0xc88] sm:$0xff] %v2489_v31 }
 0x2dd   : > { %2951 = vst [vmem:[%s4593_s3 + $0xd10] sm:$0xff] %v2285_v50 }
 0x2e0   : > { %v3681_v44 = vpop.f32.mrb[200].mxu1 }
 0x2e1   : > { %v2289_v49 = vpop.f32.mrb[216].mxu0  ;;  %2949 = vst [vmem:[%s4593_s3 + $0xd00] sm:$0xff] %v3681_v44  ;;  %v2502_v61 = vpop.f32.mrb[201].mxu1 }
 0x2e2   : > { %2953 = vst [vmem:[%s4593_s3 + $0xd20] sm:$0xff] %v2289_v49  ;;  %v2291_v58 = vpop.f32.mrb[217].mxu0  ;;  %2943 = vst [vmem:[%s4593_s3 + $0xcd0] sm:$0xff] %v2502_v61  ;;  %v3682_v51 = vpop.f32.mrb[202].mxu1 }
 0x2e3   : > { %2954 = vst [vmem:[%s4593_s3 + $0xd28] sm:$0xff] %v2291_v58  ;;  %v2293_v16 = vpop.f32.mrb[218].mxu0  ;;  %2952 = vst [vmem:[%s4593_s3 + $0xd18] sm:$0xff] %v3682_v51  ;;  %v2505_v15 = vpop.f32.mrb[203].mxu1 }
 0x2e4   : > { %2956 = vst [vmem:[%s4593_s3 + $0xd38] sm:$0xff] %v2293_v16  ;;  %v2295_v27 = vpop.f32.mrb[219].mxu0  ;;  %2946 = vst [vmem:[%s4593_s3 + $0xce8] sm:$0xff] %v2505_v15 }
 0x2e5   : > { %2957 = vst [vmem:[%s4593_s3 + $0xd40] sm:$0xff] %v2295_v27 }
 0x2e8   : > { %v3685_v56 = vpop.f32.mrb[204].mxu1 }
 0x2e9   : > { %v2299_v37 = vpop.f32.mrb[220].mxu0  ;;  %2961 = vst [vmem:[%s4593_s3 + $0xd60] sm:$0xff] %v3685_v56  ;;  %v2518_v21 = vpop.f32.mrb[205].mxu1 }
 0x2ea   : > { %2959 = vst [vmem:[%s4593_s3 + $0xd50] sm:$0xff] %v2299_v37  ;;  %v2301_v57 = vpop.f32.mrb[221].mxu0  ;;  %2955 = vst [vmem:[%s4593_s3 + $0xd30] sm:$0xff] %v2518_v21  ;;  %v3686_v59 = vpop.f32.mrb[206].mxu1 }
 0x2eb   : > { %2960 = vst [vmem:[%s4593_s3 + $0xd58] sm:$0xff] %v2301_v57  ;;  %v2303_v25 = vpop.f32.mrb[222].mxu0  ;;  %2964 = vst [vmem:[%s4593_s3 + $0xd78] sm:$0xff] %v3686_v59  ;;  %v2521_v54 = vpop.f32.mrb[207].mxu1 }
 0x2ec   : > { %2962 = vst [vmem:[%s4593_s3 + $0xd68] sm:$0xff] %v2303_v25  ;;  %v2305_v62 = vpop.f32.mrb[223].mxu0  ;;  %2958 = vst [vmem:[%s4593_s3 + $0xd48] sm:$0xff] %v2521_v54 }
 0x2ed   : > { %2963 = vst [vmem:[%s4593_s3 + $0xd70] sm:$0xff] %v2305_v62 }
 0x2ee   : > { %3817 = shalt.err (!%p3814_p3)
}
 0x2ef   : > { %s3818_s22 = scalar_lea.hbm %s5397_s8, 55296  ;;  %s3822_s25 = scalar_lea.hbm %s5452_s2, 221184 }
 0x2f0   : > { %p3819_p4 = scmp.ne.s32.totalorder %s5397_s8, %s3818_s22  ;;  %p3823_p9 = scmp.lt.u32.totalorder %s5397_s8, %s5452_s2 }
 0x2f1   : > { %p3824_p10 = scmp.lt.u32.totalorder %s3822_s25, %s3818_s22  ;;  %p3826_p12 = scmp.lt.u32.totalorder %s3818_s22, %s5397_s8 }
 0x2f2   : > { %p3820_p7 = pnand %p3819_p4, %p3924_p5 }
 0x2f3   : > { %p3825_p11 = por %p3824_p10, %p3823_p9 }
 0x2f4   : > { %p3821_p8 = pneg %p3820_p7 }
 0x2f5   : > { %p3827_p13 = por %p3826_p12, %p3825_p11 }
 0x2f7   : > { %p3828_p0 = pnand %p3827_p13, %p3821_p8 }
 0x2f9   : > { %3831 = shalt.err (!%p3828_p0)
}
 0x2fa   : > { %s3869_s28 = smov 384   ;;  %s3870_s29 = smov 24  }
 0x2fb   : > { %3762 = dma.vmem_to_hbm [thread:$0]  (%p3924_p5), %s5399_s5, 55296, %s5397_s8, %s5409_s13, %s3869_s28, %s3869_s28, %s3870_s29  }
 0x2fc PF: > { %p3769_p1 = scmp.ge.s32.totalorder %s3866_s12, 2  ;;  %s2995_s30 = sand.u32 1, %s3854_s9  }
 0x2fd   : > { %s2996_s3 = scalar_lea.sflag [#allocation3], %s2995_s30 }
 0x2fe   : > { %p3765_p2 = pnand %p3769_p1, %p3928_p6 }
 0x300   : > { %3849 = dma.done.wait (!%p3765_p2), %s2996_s3, 55296  }
 0x301   : > { %3851 = vsyncadd (!%p3765_p2), %s2996_s3, 4294912000  ;;  %p12_p3 = scmp.ge.s32.totalorder %s3911_s15, 6   ;;  %s5455_s9 = smov %s3858_s10 }
 0x302   : > { %s5456_s10 = smov %s3862_s11  ;;  %s5457_s11 = smov %s3922_s18 }
 0x303   : > { %s5458_s12 = smov %s3911_s15  ;;  %14 = sbr.rel (!%p12_p3) target bundleno = 3 (0x3), region = 66 }
 0x30a   :  { %3001 = vsyncpa [#allocation3], 1 }
 0x30b   :  { %3003 = vsyncpa [#allocation3 + $0x1], 1 }

</bundles_post_ra>
